<compile_context>
chip_gen: v7x
topology: tpu7x:2x2x1
jax: 0.10.0
libtpu: 0.0.40
codegen_flags: <defaults>
</compile_context>

<pallas_src>
import functools

import jax
import jax.numpy as jnp
from jax.experimental import pallas as pl
from jax.experimental.pallas import tpu as pltpu

F_PAD = 128           # lane width: every feature dim is zero-padded to this
NEG_SLOPE = 0.2       # GATConv default negative_slope
MASK_VALUE = -1e30    # "minus infinity" for non-edge attention logits


def _project_kernel(x_ref, w_ref, h_ref):
    # Node-feature projection for one tile of nodes: Hp = X @ W (MXU, f32 accumulate).
    h_ref[...] = jnp.dot(x_ref[...], w_ref[...], preferred_element_type=jnp.float32)


def _gat_attn_kernel(h_tgt_ref, h_all_ref, adj_ref, a_src_ref, a_dst_ref, b_ref,
                     o_ref, *, apply_relu):
    h_t = h_tgt_ref[...]          # [T, F]  projected features of this tile's target nodes
    h_s = h_all_ref[...]          # [N, F]  projected features of all (source) nodes

    # Target-side logits d[i] = <h_t[i], a_dst>  -> [T, 1]  (VPU mul + XLU lane-reduce).
    d = jnp.sum(h_t * a_dst_ref[...], axis=-1, keepdims=True)
    # Source-side logits laid out along lanes: s[0, j] = <h_s[j], a_src>  -> [1, N]
    # (tiny rhs-transposed MXU pass; keeps N on the lane axis without a relayout).
    s = jax.lax.dot_general(a_src_ref[...], h_s,
                            (((1,), (1,)), ((), ())),
                            preferred_element_type=jnp.float32)

    e = d + s                                            # [T, N] raw edge logits
    e = jnp.where(e > 0, e, NEG_SLOPE * e)               # LeakyReLU(0.2)
    e = jnp.where(adj_ref[...] > 0.5, e, MASK_VALUE)     # keep only real edges/self-loops

    # Softmax over neighbours (lane axis); self-loops guarantee >=1 valid entry per row.
    m = jnp.max(e, axis=-1, keepdims=True)
    p = jnp.exp(e - m)
    alpha = p * pl.reciprocal(jnp.sum(p, axis=-1, keepdims=True), approx=False)

    out = jnp.dot(alpha, h_s, preferred_element_type=jnp.float32) + b_ref[...]
    if apply_relu:
        out = jnp.maximum(out, 0.0)
    o_ref[...] = out.astype(o_ref.dtype)


def _choose_tile_n(n, max_tile=128):
    """Largest row tile (multiple of 8) dividing n, capped at max_tile."""
    if n <= max_tile or n % 8 != 0:
        return n                      # single full-extent block (always legal)
    t = max_tile - (max_tile % 8)
    while n % t != 0:
        t -= 8
    return t


def _pad_to(a, rows, cols):
    return jnp.pad(a, ((0, rows - a.shape[0]), (0, cols - a.shape[1])))


def _gat_layer(h, adj, w, a_src, a_dst, b, *, apply_relu, tile_n):
    n = h.shape[0]
    grid = (n // tile_n,)
    parallel = pltpu.CompilerParams(dimension_semantics=("parallel",))

    # 1) projection Hp = h @ W, gridded over node tiles (W stays VMEM-resident).
    h_proj = pl.pallas_call(
        _project_kernel,
        out_shape=jax.ShapeDtypeStruct((n, F_PAD), jnp.float32),
        grid=grid,
        in_specs=[pl.BlockSpec((tile_n, F_PAD), lambda i: (i, 0)),
                  pl.BlockSpec((F_PAD, F_PAD), lambda i: (0, 0))],
        out_specs=pl.BlockSpec((tile_n, F_PAD), lambda i: (i, 0)),
        compiler_params=parallel,
    )(h, w)

    # 2) attention + aggregation, gridded over target-node tiles. Hp (all nodes)
    #    and the small parameter rows use constant index_maps so they stay resident
    #    while the adjacency row-block and the target tile are pipelined.
    return pl.pallas_call(
        functools.partial(_gat_attn_kernel, apply_relu=apply_relu),
        out_shape=jax.ShapeDtypeStruct((n, F_PAD), jnp.float32),
        grid=grid,
        in_specs=[
            pl.BlockSpec((tile_n, F_PAD), lambda i: (i, 0)),   # Hp, target rows
            pl.BlockSpec((n, F_PAD), lambda i: (0, 0)),        # Hp, all rows (resident)
            pl.BlockSpec((tile_n, n), lambda i: (i, 0)),       # adjacency row block
            pl.BlockSpec((1, F_PAD), lambda i: (0, 0)),        # a_src
            pl.BlockSpec((1, F_PAD), lambda i: (0, 0)),        # a_dst
            pl.BlockSpec((1, F_PAD), lambda i: (0, 0)),        # bias
        ],
        out_specs=pl.BlockSpec((tile_n, F_PAD), lambda i: (i, 0)),
        compiler_params=parallel,
    )(h_proj, h_proj, adj, a_src, a_dst, b)


def gatnet_forward(x, adj, params, *, tile_n=None):
    """GATNet forward. x: [N, D_in] f32; adj: [N, N] f32 mask with adj[i, j] = 1 iff
    edge j -> i (self-loops included); params: list of (W, a_src, a_dst, b)."""
    n = x.shape[0]
    if tile_n is None:
        tile_n = _choose_tile_n(n)
    h = _pad_to(x.astype(jnp.float32), n, F_PAD)
    num_layers = len(params)
    for li, (w, a_src, a_dst, b) in enumerate(params):
        h = _gat_layer(
            h, adj,
            _pad_to(w, F_PAD, F_PAD),
            _pad_to(a_src, 1, F_PAD),
            _pad_to(a_dst, 1, F_PAD),
            _pad_to(b, 1, F_PAD),
            apply_relu=(li < num_layers - 1),
            tile_n=tile_n,
        )
    out_dim = params[-1][0].shape[1]
    return h[:, :out_dim]


def init_gat_params(key, d_in, hidden, num_layers):
    """Deterministic GATConv-style params: W [fi, fo], a_src/a_dst [1, fo], b [1, fo]."""
    dims = [d_in] + [hidden] * (num_layers - 1) + [1]
    params = []
    for l in range(num_layers):
        key, kw, ka, kb = jax.random.split(key, 4)
        fi, fo = dims[l], dims[l + 1]
        bound = 1.0 / jnp.sqrt(fi)
        w = jax.random.uniform(kw, (fi, fo), jnp.float32, -bound, bound)
        att = jax.random.uniform(ka, (2, fo), jnp.float32, -bound, bound)
        b = jax.random.uniform(kb, (1, fo), jnp.float32, -bound, bound)
        params.append((w, att[0:1], att[1:2], b))
    return params


def gatnet_ref(x, adj, params):
    """Pure-JAX dense reference (same math as torch_geometric GATConv, heads=1)."""
    h = x
    num_layers = len(params)
    for li, (w, a_src, a_dst, b) in enumerate(params):
        hp = h @ w
        d = jnp.sum(hp * a_dst, axis=-1, keepdims=True)
        s = jnp.sum(hp * a_src, axis=-1, keepdims=True).T
        e = d + s
        e = jnp.where(e > 0, e, NEG_SLOPE * e)
        e = jnp.where(adj > 0.5, e, MASK_VALUE)
        p = jnp.exp(e - jnp.max(e, axis=-1, keepdims=True))
        alpha = p / jnp.sum(p, axis=-1, keepdims=True)
        h = alpha @ hp + b
        if li < num_layers - 1:
            h = jnp.maximum(h, 0.0)
    return h


if __name__ == "__main__":
    # Small graph consistent with GATNet(D_in, H, L): N nodes, 16 input features,
    # hidden 32, 3 GAT layers. N=256 with tile_n=128 gives a 2-step pipelined grid.
    N, D_IN, H, L = 256, 16, 32, 3

    key = jax.random.PRNGKey(0)
    k_x, k_e, k_p = jax.random.split(key, 3)

    x = jax.random.normal(k_x, (N, D_IN), jnp.float32)

    # Deterministic sparse directed graph (~8 in-edges per node) densified to a mask;
    # adj[i, j] = 1 iff edge j -> i. Self-loops added (GATConv add_self_loops=True).
    # TODO(synk): sparse edge_index gather/scatter has no clean BlockSpec equivalent;
    # the COO edge list is densified into this [N, N] mask outside the kernels.
    adj = (jax.random.uniform(k_e, (N, N)) < (8.0 / N)).astype(jnp.float32)
    adj = jnp.maximum(adj, jnp.eye(N, dtype=jnp.float32))

    params = init_gat_params(k_p, D_IN, H, L)

    fwd = jax.jit(gatnet_forward)
    out = fwd(x, adj, params)
    out = jax.block_until_ready(out)

    ref = gatnet_ref(x, adj, params)
    assert out.shape == (N, 1)
    assert jnp.allclose(out, ref, atol=1e-4, rtol=1e-4), float(jnp.max(jnp.abs(out - ref)))

    print("KERNEL_OK")
</pallas_src>

<mosaic_0001>
module attributes {stable_mosaic.version = 11 : i64} {
  func.func @_project_kernel(%arg0: i32, %arg1: memref<128x128xf32, #tpu.memory_space<vmem>>, %arg2: memref<128x128xf32, #tpu.memory_space<vmem>>, %arg3: memref<128x128xf32, #tpu.memory_space<vmem>>) attributes {dimension_semantics = [#tpu.dimension_semantics<parallel>], iteration_bounds = array<i64: 2>, scalar_prefetch = 0 : i64, scratch_operands = 0 : i64, tpu.core_type = #tpu.core_type<tc>, window_params = [{transform_indices = @transform_0, window_bounds = array<i64: 128, 128>}, {pipeline_mode = #tpu.pipeline_mode<synchronous>, transform_indices = @transform_1, window_bounds = array<i64: 128, 128>}, {transform_indices = @transform_2, window_bounds = array<i64: 128, 128>}]} {
    %c0 = arith.constant 0 : index
    %c0_0 = arith.constant 0 : index
    %0 = vector.load %arg1[%c0, %c0_0] : memref<128x128xf32, #tpu.memory_space<vmem>>, vector<128x128xf32>
    %c0_1 = arith.constant 0 : index
    %c0_2 = arith.constant 0 : index
    %1 = vector.load %arg2[%c0_1, %c0_2] : memref<128x128xf32, #tpu.memory_space<vmem>>, vector<128x128xf32>
    %cst = arith.constant dense<0.000000e+00> : vector<128x128xf32>
    %2 = tpu.matmul %0, %1, %cst {dimension_numbers = #tpu.dot_dimension_numbers<[1], [0], [0], [1], [0, 0, 1, 1], [], []>} : vector<128x128xf32>, vector<128x128xf32>, vector<128x128xf32> -> vector<128x128xf32>
    %c0_3 = arith.constant 0 : index
    %c0_4 = arith.constant 0 : index
    %3 = vector.load %arg3[%c0_3, %c0_4] : memref<128x128xf32, #tpu.memory_space<vmem>>, vector<128x128xf32>
    tpu.vector_store %arg3[%c0_3, %c0_4], %2 {strides = array<i32>} : memref<128x128xf32, #tpu.memory_space<vmem>>, vector<128x128xf32>,
    return
  }
  func.func @transform_0(%arg0: i32) -> (i32, i32) {
    %c0_i32 = arith.constant 0 : i32
    %c0_i32_0 = arith.constant 0 : i32
    return %arg0, %c0_i32 : i32, i32
  }
  func.func @transform_1(%arg0: i32) -> (i32, i32) {
    %c0_i32 = arith.constant 0 : i32
    %c0_i32_0 = arith.constant 0 : i32
    %c0_i32_1 = arith.constant 0 : i32
    return %c0_i32, %c0_i32_0 : i32, i32
  }
  func.func @transform_2(%arg0: i32) -> (i32, i32) {
    %c0_i32 = arith.constant 0 : i32
    %c0_i32_0 = arith.constant 0 : i32
    return %arg0, %c0_i32 : i32, i32
  }
}

module attributes {stable_mosaic.version = 11 : i64} {
  func.func @_gat_attn_kernel(%arg0: i32, %arg1: memref<128x128xf32, #tpu.memory_space<vmem>>, %arg2: memref<256x128xf32, #tpu.memory_space<vmem>>, %arg3: memref<128x256xf32, #tpu.memory_space<vmem>>, %arg4: memref<1x128xf32, #tpu.memory_space<vmem>>, %arg5: memref<1x128xf32, #tpu.memory_space<vmem>>, %arg6: memref<1x128xf32, #tpu.memory_space<vmem>>, %arg7: memref<128x128xf32, #tpu.memory_space<vmem>>) attributes {dimension_semantics = [#tpu.dimension_semantics<parallel>], iteration_bounds = array<i64: 2>, scalar_prefetch = 0 : i64, scratch_operands = 0 : i64, tpu.core_type = #tpu.core_type<tc>, window_params = [{transform_indices = @transform_0, window_bounds = array<i64: 128, 128>}, {pipeline_mode = #tpu.pipeline_mode<synchronous>, transform_indices = @transform_1, window_bounds = array<i64: 256, 128>}, {transform_indices = @transform_2, window_bounds = array<i64: 128, 256>}, {pipeline_mode = #tpu.pipeline_mode<synchronous>, transform_indices = @transform_3, window_bounds = array<i64: 1, 128>}, {pipeline_mode = #tpu.pipeline_mode<synchronous>, transform_indices = @transform_4, window_bounds = array<i64: 1, 128>}, {pipeline_mode = #tpu.pipeline_mode<synchronous>, transform_indices = @transform_5, window_bounds = array<i64: 1, 128>}, {transform_indices = @transform_6, window_bounds = array<i64: 128, 128>}]} {
    %c0 = arith.constant 0 : index
    %c0_0 = arith.constant 0 : index
    %0 = vector.load %arg1[%c0, %c0_0] : memref<128x128xf32, #tpu.memory_space<vmem>>, vector<128x128xf32>
    %c0_1 = arith.constant 0 : index
    %c0_2 = arith.constant 0 : index
    %1 = vector.load %arg2[%c0_1, %c0_2] : memref<256x128xf32, #tpu.memory_space<vmem>>, vector<256x128xf32>
    %c0_3 = arith.constant 0 : index
    %c0_4 = arith.constant 0 : index
    %2 = vector.load %arg5[%c0_3, %c0_4] : memref<1x128xf32, #tpu.memory_space<vmem>>, vector<1x128xf32>
    %3 = vector.broadcast %2 : vector<1x128xf32> to vector<128x128xf32>
    %4 = arith.mulf %0, %3 : vector<128x128xf32>
    %cst = arith.constant dense<0.000000e+00> : vector<128xf32>
    %5 = vector.multi_reduction <add>, %4, %cst [1] : vector<128x128xf32> to vector<128xf32>
    %6 = vector.shape_cast %5 : vector<128xf32> to vector<128x1xf32>
    %c0_5 = arith.constant 0 : index
    %c0_6 = arith.constant 0 : index
    %7 = vector.load %arg4[%c0_5, %c0_6] : memref<1x128xf32, #tpu.memory_space<vmem>>, vector<1x128xf32>
    %cst_7 = arith.constant dense<0.000000e+00> : vector<1x256xf32>
    %8 = tpu.matmul %7, %1, %cst_7 {dimension_numbers = #tpu.dot_dimension_numbers<[1], [1], [0], [0], [0, 0, 1, 0], [], []>} : vector<1x128xf32>, vector<256x128xf32>, vector<1x256xf32> -> vector<1x256xf32>
    %9 = vector.broadcast %6 : vector<128x1xf32> to vector<128x256xf32>
    %10 = vector.broadcast %8 : vector<1x256xf32> to vector<128x256xf32>
    %11 = arith.addf %9, %10 : vector<128x256xf32>
    %cst_8 = arith.constant 0.000000e+00 : f32
    %12 = vector.broadcast %cst_8 : f32 to vector<128x256xf32>
    %13 = arith.cmpf ogt, %11, %12 : vector<128x256xf32>
    %cst_9 = arith.constant 2.000000e-01 : f32
    %14 = vector.broadcast %cst_9 : f32 to vector<128x256xf32>
    %15 = arith.mulf %14, %11 : vector<128x256xf32>
    %16 = arith.select %13, %11, %15 : vector<128x256xi1>, vector<128x256xf32>
    %c0_10 = arith.constant 0 : index
    %c0_11 = arith.constant 0 : index
    %17 = vector.load %arg3[%c0_10, %c0_11] : memref<128x256xf32, #tpu.memory_space<vmem>>, vector<128x256xf32>
    %cst_12 = arith.constant 5.000000e-01 : f32
    %18 = vector.broadcast %cst_12 : f32 to vector<128x256xf32>
    %19 = arith.cmpf ogt, %17, %18 : vector<128x256xf32>
    %cst_13 = arith.constant -1.000000e+30 : f32
    %20 = vector.broadcast %cst_13 : f32 to vector<128x256xf32>
    %21 = arith.select %19, %16, %20 : vector<128x256xi1>, vector<128x256xf32>
    %cst_14 = arith.constant dense<0xFF800000> : vector<128xf32>
    %22 = vector.multi_reduction <maximumf>, %21, %cst_14 [1] : vector<128x256xf32> to vector<128xf32>
    %23 = vector.shape_cast %22 : vector<128xf32> to vector<128x1xf32>
    %24 = vector.broadcast %23 : vector<128x1xf32> to vector<128x256xf32>
    %25 = arith.subf %21, %24 : vector<128x256xf32>
    %26 = math.exp %25 : vector<128x256xf32>
    %cst_15 = arith.constant dense<0.000000e+00> : vector<128xf32>
    %27 = vector.multi_reduction <add>, %26, %cst_15 [1] : vector<128x256xf32> to vector<128xf32>
    %28 = vector.shape_cast %27 : vector<128xf32> to vector<128x1xf32>
    %29 = tpu.reciprocal %28 : vector<128x1xf32> -> vector<128x1xf32>
    %30 = vector.broadcast %29 : vector<128x1xf32> to vector<128x256xf32>
    %31 = arith.mulf %26, %30 : vector<128x256xf32>
    %cst_16 = arith.constant dense<0.000000e+00> : vector<128x128xf32>
    %32 = tpu.matmul %31, %1, %cst_16 {dimension_numbers = #tpu.dot_dimension_numbers<[1], [0], [0], [1], [0, 0, 1, 1], [], []>} : vector<128x256xf32>, vector<256x128xf32>, vector<128x128xf32> -> vector<128x128xf32>
    %c0_17 = arith.constant 0 : index
    %c0_18 = arith.constant 0 : index
    %33 = vector.load %arg6[%c0_17, %c0_18] : memref<1x128xf32, #tpu.memory_space<vmem>>, vector<1x128xf32>
    %34 = vector.broadcast %33 : vector<1x128xf32> to vector<128x128xf32>
    %35 = arith.addf %32, %34 : vector<128x128xf32>
    %c0_19 = arith.constant 0 : index
    %c0_20 = arith.constant 0 : index
    %36 = vector.load %arg7[%c0_19, %c0_20] : memref<128x128xf32, #tpu.memory_space<vmem>>, vector<128x128xf32>
    tpu.vector_store %arg7[%c0_19, %c0_20], %35 {strides = array<i32>} : memref<128x128xf32, #tpu.memory_space<vmem>>, vector<128x128xf32>,
    return
  }
  func.func @transform_0(%arg0: i32) -> (i32, i32) {
    %c0_i32 = arith.constant 0 : i32
    %c0_i32_0 = arith.constant 0 : i32
    return %arg0, %c0_i32 : i32, i32
  }
  func.func @transform_1(%arg0: i32) -> (i32, i32) {
    %c0_i32 = arith.constant 0 : i32
    %c0_i32_0 = arith.constant 0 : i32
    %c0_i32_1 = arith.constant 0 : i32
    return %c0_i32, %c0_i32_0 : i32, i32
  }
  func.func @transform_2(%arg0: i32) -> (i32, i32) {
    %c0_i32 = arith.constant 0 : i32
    %c0_i32_0 = arith.constant 0 : i32
    return %arg0, %c0_i32 : i32, i32
  }
  func.func @transform_3(%arg0: i32) -> (i32, i32) {
    %c0_i32 = arith.constant 0 : i32
    %c0_i32_0 = arith.constant 0 : i32
    %c0_i32_1 = arith.constant 0 : i32
    return %c0_i32, %c0_i32_0 : i32, i32
  }
  func.func @transform_4(%arg0: i32) -> (i32, i32) {
    %c0_i32 = arith.constant 0 : i32
    %c0_i32_0 = arith.constant 0 : i32
    %c0_i32_1 = arith.constant 0 : i32
    return %c0_i32, %c0_i32_0 : i32, i32
  }
  func.func @transform_5(%arg0: i32) -> (i32, i32) {
    %c0_i32 = arith.constant 0 : i32
    %c0_i32_0 = arith.constant 0 : i32
    %c0_i32_1 = arith.constant 0 : i32
    return %c0_i32, %c0_i32_0 : i32, i32
  }
  func.func @transform_6(%arg0: i32) -> (i32, i32) {
    %c0_i32 = arith.constant 0 : i32
    %c0_i32_0 = arith.constant 0 : i32
    return %arg0, %c0_i32 : i32, i32
  }
}

module attributes {stable_mosaic.version = 11 : i64} {
  func.func @_gat_attn_kernel(%arg0: i32, %arg1: memref<128x128xf32, #tpu.memory_space<vmem>>, %arg2: memref<256x128xf32, #tpu.memory_space<vmem>>, %arg3: memref<128x256xf32, #tpu.memory_space<vmem>>, %arg4: memref<1x128xf32, #tpu.memory_space<vmem>>, %arg5: memref<1x128xf32, #tpu.memory_space<vmem>>, %arg6: memref<1x128xf32, #tpu.memory_space<vmem>>, %arg7: memref<128x128xf32, #tpu.memory_space<vmem>>) attributes {dimension_semantics = [#tpu.dimension_semantics<parallel>], iteration_bounds = array<i64: 2>, scalar_prefetch = 0 : i64, scratch_operands = 0 : i64, tpu.core_type = #tpu.core_type<tc>, window_params = [{transform_indices = @transform_0, window_bounds = array<i64: 128, 128>}, {pipeline_mode = #tpu.pipeline_mode<synchronous>, transform_indices = @transform_1, window_bounds = array<i64: 256, 128>}, {transform_indices = @transform_2, window_bounds = array<i64: 128, 256>}, {pipeline_mode = #tpu.pipeline_mode<synchronous>, transform_indices = @transform_3, window_bounds = array<i64: 1, 128>}, {pipeline_mode = #tpu.pipeline_mode<synchronous>, transform_indices = @transform_4, window_bounds = array<i64: 1, 128>}, {pipeline_mode = #tpu.pipeline_mode<synchronous>, transform_indices = @transform_5, window_bounds = array<i64: 1, 128>}, {transform_indices = @transform_6, window_bounds = array<i64: 128, 128>}]} {
    %c0 = arith.constant 0 : index
    %c0_0 = arith.constant 0 : index
    %0 = vector.load %arg1[%c0, %c0_0] : memref<128x128xf32, #tpu.memory_space<vmem>>, vector<128x128xf32>
    %c0_1 = arith.constant 0 : index
    %c0_2 = arith.constant 0 : index
    %1 = vector.load %arg2[%c0_1, %c0_2] : memref<256x128xf32, #tpu.memory_space<vmem>>, vector<256x128xf32>
    %c0_3 = arith.constant 0 : index
    %c0_4 = arith.constant 0 : index
    %2 = vector.load %arg5[%c0_3, %c0_4] : memref<1x128xf32, #tpu.memory_space<vmem>>, vector<1x128xf32>
    %3 = vector.broadcast %2 : vector<1x128xf32> to vector<128x128xf32>
    %4 = arith.mulf %0, %3 : vector<128x128xf32>
    %cst = arith.constant dense<0.000000e+00> : vector<128xf32>
    %5 = vector.multi_reduction <add>, %4, %cst [1] : vector<128x128xf32> to vector<128xf32>
    %6 = vector.shape_cast %5 : vector<128xf32> to vector<128x1xf32>
    %c0_5 = arith.constant 0 : index
    %c0_6 = arith.constant 0 : index
    %7 = vector.load %arg4[%c0_5, %c0_6] : memref<1x128xf32, #tpu.memory_space<vmem>>, vector<1x128xf32>
    %cst_7 = arith.constant dense<0.000000e+00> : vector<1x256xf32>
    %8 = tpu.matmul %7, %1, %cst_7 {dimension_numbers = #tpu.dot_dimension_numbers<[1], [1], [0], [0], [0, 0, 1, 0], [], []>} : vector<1x128xf32>, vector<256x128xf32>, vector<1x256xf32> -> vector<1x256xf32>
    %9 = vector.broadcast %6 : vector<128x1xf32> to vector<128x256xf32>
    %10 = vector.broadcast %8 : vector<1x256xf32> to vector<128x256xf32>
    %11 = arith.addf %9, %10 : vector<128x256xf32>
    %cst_8 = arith.constant 0.000000e+00 : f32
    %12 = vector.broadcast %cst_8 : f32 to vector<128x256xf32>
    %13 = arith.cmpf ogt, %11, %12 : vector<128x256xf32>
    %cst_9 = arith.constant 2.000000e-01 : f32
    %14 = vector.broadcast %cst_9 : f32 to vector<128x256xf32>
    %15 = arith.mulf %14, %11 : vector<128x256xf32>
    %16 = arith.select %13, %11, %15 : vector<128x256xi1>, vector<128x256xf32>
    %c0_10 = arith.constant 0 : index
    %c0_11 = arith.constant 0 : index
    %17 = vector.load %arg3[%c0_10, %c0_11] : memref<128x256xf32, #tpu.memory_space<vmem>>, vector<128x256xf32>
    %cst_12 = arith.constant 5.000000e-01 : f32
    %18 = vector.broadcast %cst_12 : f32 to vector<128x256xf32>
    %19 = arith.cmpf ogt, %17, %18 : vector<128x256xf32>
    %cst_13 = arith.constant -1.000000e+30 : f32
    %20 = vector.broadcast %cst_13 : f32 to vector<128x256xf32>
    %21 = arith.select %19, %16, %20 : vector<128x256xi1>, vector<128x256xf32>
    %cst_14 = arith.constant dense<0xFF800000> : vector<128xf32>
    %22 = vector.multi_reduction <maximumf>, %21, %cst_14 [1] : vector<128x256xf32> to vector<128xf32>
    %23 = vector.shape_cast %22 : vector<128xf32> to vector<128x1xf32>
    %24 = vector.broadcast %23 : vector<128x1xf32> to vector<128x256xf32>
    %25 = arith.subf %21, %24 : vector<128x256xf32>
    %26 = math.exp %25 : vector<128x256xf32>
    %cst_15 = arith.constant dense<0.000000e+00> : vector<128xf32>
    %27 = vector.multi_reduction <add>, %26, %cst_15 [1] : vector<128x256xf32> to vector<128xf32>
    %28 = vector.shape_cast %27 : vector<128xf32> to vector<128x1xf32>
    %29 = tpu.reciprocal %28 : vector<128x1xf32> -> vector<128x1xf32>
    %30 = vector.broadcast %29 : vector<128x1xf32> to vector<128x256xf32>
    %31 = arith.mulf %26, %30 : vector<128x256xf32>
    %cst_16 = arith.constant dense<0.000000e+00> : vector<128x128xf32>
    %32 = tpu.matmul %31, %1, %cst_16 {dimension_numbers = #tpu.dot_dimension_numbers<[1], [0], [0], [1], [0, 0, 1, 1], [], []>} : vector<128x256xf32>, vector<256x128xf32>, vector<128x128xf32> -> vector<128x128xf32>
    %c0_17 = arith.constant 0 : index
    %c0_18 = arith.constant 0 : index
    %33 = vector.load %arg6[%c0_17, %c0_18] : memref<1x128xf32, #tpu.memory_space<vmem>>, vector<1x128xf32>
    %34 = vector.broadcast %33 : vector<1x128xf32> to vector<128x128xf32>
    %35 = arith.addf %32, %34 : vector<128x128xf32>
    %cst_19 = arith.constant 0.000000e+00 : f32
    %36 = vector.broadcast %cst_19 : f32 to vector<128x128xf32>
    %37 = arith.maximumf %35, %36 : vector<128x128xf32>
    %c0_20 = arith.constant 0 : index
    %c0_21 = arith.constant 0 : index
    %38 = vector.load %arg7[%c0_20, %c0_21] : memref<128x128xf32, #tpu.memory_space<vmem>>, vector<128x128xf32>
    tpu.vector_store %arg7[%c0_20, %c0_21], %37 {strides = array<i32>} : memref<128x128xf32, #tpu.memory_space<vmem>>, vector<128x128xf32>,
    return
  }
  func.func @transform_0(%arg0: i32) -> (i32, i32) {
    %c0_i32 = arith.constant 0 : i32
    %c0_i32_0 = arith.constant 0 : i32
    return %arg0, %c0_i32 : i32, i32
  }
  func.func @transform_1(%arg0: i32) -> (i32, i32) {
    %c0_i32 = arith.constant 0 : i32
    %c0_i32_0 = arith.constant 0 : i32
    %c0_i32_1 = arith.constant 0 : i32
    return %c0_i32, %c0_i32_0 : i32, i32
  }
  func.func @transform_2(%arg0: i32) -> (i32, i32) {
    %c0_i32 = arith.constant 0 : i32
    %c0_i32_0 = arith.constant 0 : i32
    return %arg0, %c0_i32 : i32, i32
  }
  func.func @transform_3(%arg0: i32) -> (i32, i32) {
    %c0_i32 = arith.constant 0 : i32
    %c0_i32_0 = arith.constant 0 : i32
    %c0_i32_1 = arith.constant 0 : i32
    return %c0_i32, %c0_i32_0 : i32, i32
  }
  func.func @transform_4(%arg0: i32) -> (i32, i32) {
    %c0_i32 = arith.constant 0 : i32
    %c0_i32_0 = arith.constant 0 : i32
    %c0_i32_1 = arith.constant 0 : i32
    return %c0_i32, %c0_i32_0 : i32, i32
  }
  func.func @transform_5(%arg0: i32) -> (i32, i32) {
    %c0_i32 = arith.constant 0 : i32
    %c0_i32_0 = arith.constant 0 : i32
    %c0_i32_1 = arith.constant 0 : i32
    return %c0_i32, %c0_i32_0 : i32, i32
  }
  func.func @transform_6(%arg0: i32) -> (i32, i32) {
    %c0_i32 = arith.constant 0 : i32
    %c0_i32_0 = arith.constant 0 : i32
    return %arg0, %c0_i32 : i32, i32
  }
}

</mosaic_0001>

<bundles_post_ra>
// kernel: gatnet_forward.6
= control target key start
LH: loop header
LB: loop body
LE: loop exit
PB: predicated region body
PF: predicated region fallthrough
CT: control target
= control target key end

     0   :  { %s574_s9 = smov 0   ;;  %s682_s0 = inlined_call_operand.vmem [shape: f32[256,128], index: 0, kind: input, shape index: {}]   ;;  %s683_s1 = inlined_call_operand.vmem [shape: f32[128,128], index: 1, kind: input, shape index: {}]   ;;  %s684_s2 = inlined_call_operand.vmem [shape: f32[256,128], index: 2, kind: output, shape index: {}]  }
   0x1 LB: > { %s396_s10 = sadd.s32 4294967295, %s557_s9   ;;  %p400_p0 = scmp.ge.s32.totalorder %s557_s9, 1  ;;  %s557_s9 = sphi %s574_s9, %s12_s9  }
   0x2   : > { %p113_p1 = scmp.lt.s32.totalorder %s557_s9, 3 }
   0x4   : > { %p114_p2 = pnand %p400_p0, %p113_p1 }
   0x5   : > { %v163_v0 = vld [vmem:[%s683_s1] sm:$0xff] (!%p114_p2)  ;;  %v164_v1 = vld [vmem:[%s683_s1 + $0x8] sm:$0xff] (!%p114_p2)  ;;  %v165_v2 = vld [vmem:[%s683_s1 + $0x10] sm:$0xff] (!%p114_p2)  ;;  %s401_s17 = sshll.u32 (!%p114_p2), %s396_s10, 4 }
   0x6   : > { %117 = sbr.rel (%p114_p2) target bundleno = 267 (0x10b), region = 28  ;;  %v495_v3 = vpack.c.bf16 (!%p114_p2), %v164_v1, %v163_v0  ;;  %v166_v4 = vld [vmem:[%s683_s1 + $0x18] sm:$0xff] (!%p114_p2)  ;;  %p136_p3 = scmp.lt.s32.totalorder (!%p114_p2), %s401_s17, 31  ;;  %v167_v6 = vld [vmem:[%s683_s1 + $0x20] sm:$0xff] (!%p114_p2)  ;;  %v168_v7 = vld [vmem:[%s683_s1 + $0x28] sm:$0xff] (!%p114_p2) }
   0x7   : > { %v499_v5 = vpack.c.bf16 (!%p114_p2), %v166_v4, %v165_v2  ;;  %v503_v8 = vpack.c.bf16 (!%p114_p2), %v168_v7, %v167_v6  ;;  %v169_v9 = vld [vmem:[%s683_s1 + $0x30] sm:$0xff] (!%p114_p2)  ;;  %v170_v10 = vld [vmem:[%s683_s1 + $0x38] sm:$0xff] (!%p114_p2)  ;;  %v171_v14 = vld [vmem:[%s683_s1 + $0x40] sm:$0xff] (!%p114_p2) }
   0x8   : > { %496 = vmatprep.subr.bf16.mxu0 (!%p114_p2), %v495_v3  ;;  %527 = vmatprep.subr.bf16.mxu1 (!%p114_p2), %v495_v3  ;;  %v507_v13 = vpack.c.bf16 (!%p114_p2), %v170_v10, %v169_v9  ;;  %v172_v15 = vld [vmem:[%s683_s1 + $0x48] sm:$0xff] (!%p114_p2)  ;;  %v173_v17 = vld [vmem:[%s683_s1 + $0x50] sm:$0xff] (!%p114_p2)  ;;  %v174_v18 = vld [vmem:[%s683_s1 + $0x58] sm:$0xff] (!%p114_p2) }
   0x9   : > { %498 = vmatpush3.bf16.msra.mxu0 (!%p114_p2), %v495_v3  ;;  %535 = vmatpush3.bf16.msra.mxu1 (!%p114_p2), %v495_v3  ;;  %v511_v16 = vpack.c.bf16 (!%p114_p2), %v172_v15, %v171_v14  ;;  %v515_v19 = vpack.c.bf16 (!%p114_p2), %v174_v18, %v173_v17  ;;  %v175_v20 = vld [vmem:[%s683_s1 + $0x60] sm:$0xff] (!%p114_p2)  ;;  %v176_v21 = vld [vmem:[%s683_s1 + $0x68] sm:$0xff] (!%p114_p2)  ;;  %v177_v23 = vld [vmem:[%s683_s1 + $0x70] sm:$0xff] (!%p114_p2) }
   0xa   : > { %500 = vmatprep.subr.bf16.mxu0 (!%p114_p2), %v499_v5  ;;  %528 = vmatprep.subr.bf16.mxu1 (!%p114_p2), %v499_v5  ;;  %v519_v22 = vpack.c.bf16 (!%p114_p2), %v176_v21, %v175_v20  ;;  %v178_v24 = vld [vmem:[%s683_s1 + $0x78] sm:$0xff] (!%p114_p2) }
   0xb   : > { %v523_v25 = vpack.c.bf16 (!%p114_p2), %v178_v24, %v177_v23 }
   0xd   : > { %s686_s17 = smov (!%p136_p3, %s401_s17), 31  ;;  %502 = vmatpush3.bf16.msra.mxu0 %v499_v5  ;;  %536 = vmatpush3.bf16.msra.mxu1 %v499_v5 }
   0xe   : > { %s402_s24 = sshll.u32 %s686_s17, 3  ;;  %504 = vmatprep.subr.bf16.mxu0 %v503_v8  ;;  %529 = vmatprep.subr.bf16.mxu1 %v503_v8 }
   0xf   : > { %s614_s3 = scalar_lea.vmem %s682_s0, %s402_s24  ;;  %s661_s25 = scalar_lea.vmem %s684_s2, %s402_s24 }
  0x10   : > { %v147_v11 = vld [vmem:[%s614_s3] sm:$0xff]  ;;  %v148_v26 = vld [vmem:[%s614_s3 + $0x8] sm:$0xff]  ;;  %v149_v28 = vld [vmem:[%s614_s3 + $0x10] sm:$0xff] }
  0x11   : > { %v155_v12 = vld [vmem:[%s614_s3 + $0x40] sm:$0xff]  ;;  %471 = vmatprep.mubr.f32.mxu0 %v147_v11  ;;  %506 = vmatpush3.bf16.msra.mxu0 %v503_v8  ;;  %v156_v27 = vld [vmem:[%s614_s3 + $0x48] sm:$0xff]  ;;  %v157_v29 = vld [vmem:[%s614_s3 + $0x50] sm:$0xff] }
  0x12   : > { %483 = vmatprep.mubr.f32.mxu1 %v155_v12  ;;  %537 = vmatpush3.bf16.msra.mxu1 %v503_v8  ;;  %v150_v30 = vld [vmem:[%s614_s3 + $0x18] sm:$0xff]  ;;  %v151_v32 = vld [vmem:[%s614_s3 + $0x20] sm:$0xff]  ;;  %v152_v34 = vld [vmem:[%s614_s3 + $0x28] sm:$0xff] }
  0x13   : > { %508 = vmatprep.subr.bf16.mxu0 %v507_v13  ;;  %530 = vmatprep.subr.bf16.mxu1 %v507_v13  ;;  %v158_v31 = vld [vmem:[%s614_s3 + $0x58] sm:$0xff]  ;;  %v159_v33 = vld [vmem:[%s614_s3 + $0x60] sm:$0xff]  ;;  %v160_v35 = vld [vmem:[%s614_s3 + $0x68] sm:$0xff] }
  0x14   : > { %v153_v36 = vld [vmem:[%s614_s3 + $0x30] sm:$0xff]  ;;  %v154_v38 = vld [vmem:[%s614_s3 + $0x38] sm:$0xff] }
  0x15   : > { %510 = vmatpush3.bf16.msra.mxu0 %v507_v13  ;;  %v161_v37 = vld [vmem:[%s614_s3 + $0x70] sm:$0xff]  ;;  %v162_v39 = vld [vmem:[%s614_s3 + $0x78] sm:$0xff] }
  0x16   : > { %538 = vmatpush3.bf16.msra.mxu1 %v507_v13  ;;  %512 = vmatprep.subr.bf16.mxu0 %v511_v16 }
  0x17   : > { %531 = vmatprep.subr.bf16.mxu1 %v511_v16 }
  0x19   : > { %514 = vmatpush3.bf16.msra.mxu0 %v511_v16 }
  0x1a   : > { %539 = vmatpush3.bf16.msra.mxu1 %v511_v16  ;;  %516 = vmatprep.subr.bf16.mxu0 %v515_v19 }
  0x1b   : > { %532 = vmatprep.subr.bf16.mxu1 %v515_v19 }
  0x1d   : > { %518 = vmatpush3.bf16.msra.mxu0 %v515_v19 }
  0x1e   : > { %540 = vmatpush3.bf16.msra.mxu1 %v515_v19  ;;  %520 = vmatprep.subr.bf16.mxu0 %v519_v22 }
  0x1f   : > { %533 = vmatprep.subr.bf16.mxu1 %v519_v22 }
  0x21   : > { %522 = vmatpush3.bf16.msra.mxu0 %v519_v22 }
  0x22   : > { %541 = vmatpush3.bf16.msra.mxu1 %v519_v22  ;;  %524 = vmatprep.subr.bf16.mxu0 %v523_v25 }
  0x23   : > { %534 = vmatprep.subr.bf16.mxu1 %v523_v25 }
  0x25   : > { %526 = vmatpush3.bf16.msra.mxu0 %v523_v25 }
  0x26   : > { %542 = vmatpush3.bf16.msra.mxu1 %v523_v25 }
  0x28   : > { %472 = vmatmul.mubr.f32.vlgmr.msra.gmra.mrb[0].mxu0 %v148_v26 }
  0x29   : > { %484 = vmatmul.mubr.f32.vlgmr.msra.gmra.mrb[0].mxu1 %v156_v27  ;;  %474 = vmatprep.mubr.f32.mxu0 %v149_v28 }
  0x2a   : > { %486 = vmatprep.mubr.f32.mxu1 %v157_v29 }
  0x2c   : > { %475 = vmatmul.mubr.f32.gmra.mrb[2].mxu0 %v150_v30 }
  0x2d   : > { %487 = vmatmul.mubr.f32.gmra.mrb[2].mxu1 %v158_v31  ;;  %477 = vmatprep.mubr.f32.mxu0 %v151_v32 }
  0x2e   : > { %489 = vmatprep.mubr.f32.mxu1 %v159_v33 }
  0x30   : > { %478 = vmatmul.mubr.f32.gmra.mrb[4].mxu0 %v152_v34 }
  0x31   : > { %490 = vmatmul.mubr.f32.gmra.mrb[4].mxu1 %v160_v35  ;;  %480 = vmatprep.mubr.f32.mxu0 %v153_v36 }
  0x32   : > { %492 = vmatprep.mubr.f32.mxu1 %v161_v37 }
  0x34   : > { %481 = vmatmul.mubr.f32.gmra.mrb[6].mxu0 %v154_v38 }
  0x35   : > { %493 = vmatmul.mubr.f32.gmra.mrb[6].mxu1 %v162_v39 }
  0xfb   : > { %v473_v40 = vpop.f32.mrb[0].mxu0 }
  0xfc   : > { %v485_v41 = vpop.f32.mrb[0].mxu1  ;;  %325 = vst [vmem:[%s661_s25 + $0x8] sm:$0xff] %v473_v40  ;;  %v245_v42 = vpop.f32.mrb[1].mxu0 }
  0xfd   : > { %333 = vst [vmem:[%s661_s25 + $0x48] sm:$0xff] %v485_v41  ;;  %v285_v43 = vpop.f32.mrb[1].mxu1  ;;  %324 = vst [vmem:[%s661_s25] sm:$0xff] %v245_v42 }
  0xfe   : > { %332 = vst [vmem:[%s661_s25 + $0x40] sm:$0xff] %v285_v43 }
  0xff   : > { %v476_v44 = vpop.f32.mrb[2].mxu0 }
 0x100   : > { %v488_v45 = vpop.f32.mrb[2].mxu1  ;;  %327 = vst [vmem:[%s661_s25 + $0x18] sm:$0xff] %v476_v44  ;;  %v255_v46 = vpop.f32.mrb[3].mxu0 }
 0x101   : > { %335 = vst [vmem:[%s661_s25 + $0x58] sm:$0xff] %v488_v45  ;;  %v295_v47 = vpop.f32.mrb[3].mxu1  ;;  %326 = vst [vmem:[%s661_s25 + $0x10] sm:$0xff] %v255_v46 }
 0x102   : > { %334 = vst [vmem:[%s661_s25 + $0x50] sm:$0xff] %v295_v47 }
 0x103   : > { %v479_v48 = vpop.f32.mrb[4].mxu0 }
 0x104   : > { %v491_v49 = vpop.f32.mrb[4].mxu1  ;;  %329 = vst [vmem:[%s661_s25 + $0x28] sm:$0xff] %v479_v48  ;;  %v265_v50 = vpop.f32.mrb[5].mxu0 }
 0x105   : > { %337 = vst [vmem:[%s661_s25 + $0x68] sm:$0xff] %v491_v49  ;;  %v305_v51 = vpop.f32.mrb[5].mxu1  ;;  %328 = vst [vmem:[%s661_s25 + $0x20] sm:$0xff] %v265_v50 }
 0x106   : > { %336 = vst [vmem:[%s661_s25 + $0x60] sm:$0xff] %v305_v51 }
 0x107   : > { %v482_v52 = vpop.f32.mrb[6].mxu0 }
 0x108   : > { %v494_v53 = vpop.f32.mrb[6].mxu1  ;;  %331 = vst [vmem:[%s661_s25 + $0x38] sm:$0xff] %v482_v52  ;;  %v275_v54 = vpop.f32.mrb[7].mxu0 }
 0x109   : > { %339 = vst [vmem:[%s661_s25 + $0x78] sm:$0xff] %v494_v53  ;;  %v315_v55 = vpop.f32.mrb[7].mxu1  ;;  %330 = vst [vmem:[%s661_s25 + $0x30] sm:$0xff] %v275_v54 }
 0x10a   : > { %338 = vst [vmem:[%s661_s25 + $0x70] sm:$0xff] %v315_v55 }
 0x10b PF: > { %s12_s9 = sadd.s32 1, %s557_s9  }
 0x10c   : > { %p9_p4 = scmp.ge.s32.totalorder %s12_s9, 4  }
 0x10e   :  { %11 = sbr.rel (!%p9_p4) target bundleno = 1 (0x1), region = 58 }

// kernel: gatnet_forward.7
= control target key start
LH: loop header
LB: loop body
LE: loop exit
PB: predicated region body
PF: predicated region fallthrough
CT: control target
= control target key end

     0   :  { %s1521_s21 = smov 0   ;;  %s2290_s0 = inlined_call_operand.vmem [shape: f32[256,128], index: 0, kind: input, shape index: {}, may-alias: {0,1}]   ;;  %s2291_s1 = inlined_call_operand.vmem [shape: f32[256,128], index: 1, kind: input, shape index: {}, may-alias: {0,1}]   ;;  %s2292_s2 = inlined_call_operand.vmem [shape: f32[256,256], index: 2, kind: input, shape index: {}]   ;;  %s2293_s3 = inlined_call_operand.vmem [shape: f32[1,128], index: 3, kind: input, shape index: {}]   ;;  %s2294_s4 = inlined_call_operand.vmem [shape: f32[1,128], index: 4, kind: input, shape index: {}]   ;;  %s2295_s5 = inlined_call_operand.vmem [shape: f32[1,128], index: 5, kind: input, shape index: {}]   ;;  %s2296_s6 = inlined_call_operand.vmem [shape: f32[256,128], index: 6, kind: output, shape index: {}]  }
   0x1 LB: > { %s1179_s22 = sadd.s32 4294967295, %s1484_s21   ;;  %p1183_p0 = scmp.ge.s32.totalorder %s1484_s21, 1  ;;  %s1484_s21 = sphi %s1521_s21, %s16_s21  }
   0x2   : > { %p225_p1 = scmp.lt.s32.totalorder %s1484_s21, 3 }
   0x4   : > { %p226_p2 = pnand %p1183_p0, %p225_p1 }
   0x5   : > { %v312_v0 = vld [vmem:[%s2291_s1 + $0x80] sm:$0xff] (!%p226_p2)  ;;  %v313_v1 = vld [vmem:[%s2291_s1 + $0x88] sm:$0xff] (!%p226_p2)  ;;  %s1184_s29 = sshll.u32 (!%p226_p2), %s1179_s22, 4  ;;  %v314_v5 = vld [vmem:[%s2291_s1 + $0x90] sm:$0xff] (!%p226_p2) }
   0x6   : > { %229 = sbr.rel (%p226_p2) target bundleno = 894 (0x37e), region = 44  ;;  %v296_v2 = vld [vmem:[%s2291_s1] sm:$0xff] (!%p226_p2)  ;;  %v1310_v3 = vpack.c.bf16 (!%p226_p2), %v313_v1, %v312_v0  ;;  %v297_v4 = vld [vmem:[%s2291_s1 + $0x8] sm:$0xff] (!%p226_p2)  ;;  %v315_v6 = vld [vmem:[%s2291_s1 + $0x98] sm:$0xff] (!%p226_p2)  ;;  %p262_p3 = scmp.lt.s32.totalorder (!%p226_p2), %s1184_s29, 31 }
   0x7   : > { %v1312_v7 = vpack.c.bf16 (!%p226_p2), %v297_v4, %v296_v2  ;;  %v1314_v8 = vpack.c.bf16 (!%p226_p2), %v315_v6, %v314_v5  ;;  %v298_v9 = vld [vmem:[%s2291_s1 + $0x10] sm:$0xff] (!%p226_p2)  ;;  %v299_v10 = vld [vmem:[%s2291_s1 + $0x18] sm:$0xff] (!%p226_p2)  ;;  %v316_v11 = vld [vmem:[%s2291_s1 + $0xa0] sm:$0xff] (!%p226_p2) }
   0x8   : > { %1311 = vmatprep.subr.bf16.mxu0 (!%p226_p2), %v1310_v3  ;;  %1343 = vmatprep.subr.bf16.mxu1 (!%p226_p2), %v1310_v3  ;;  %v317_v12 = vld [vmem:[%s2291_s1 + $0xa8] sm:$0xff] (!%p226_p2)  ;;  %v1316_v13 = vpack.c.bf16 (!%p226_p2), %v299_v10, %v298_v9  ;;  %v300_v15 = vld [vmem:[%s2291_s1 + $0x20] sm:$0xff] (!%p226_p2)  ;;  %v318_v17 = vld [vmem:[%s2291_s1 + $0xb0] sm:$0xff] (!%p226_p2) }
   0x9   : > { %1313 = vmatpush3.bf16.xpose.msra.mxu0 (!%p226_p2), %v1312_v7  ;;  %1345 = vmatpush3.bf16.msra.mxu1 (!%p226_p2), %v1312_v7  ;;  %v1318_v14 = vpack.c.bf16 (!%p226_p2), %v317_v12, %v316_v11  ;;  %v301_v16 = vld [vmem:[%s2291_s1 + $0x28] sm:$0xff] (!%p226_p2)  ;;  %v319_v18 = vld [vmem:[%s2291_s1 + $0xb8] sm:$0xff] (!%p226_p2)  ;;  %v302_v19 = vld [vmem:[%s2291_s1 + $0x30] sm:$0xff] (!%p226_p2) }
   0xa   : > { %1315 = vmatprep.subr.bf16.mxu0 (!%p226_p2), %v1314_v8  ;;  %1347 = vmatprep.subr.bf16.mxu1 (!%p226_p2), %v1314_v8  ;;  %v1320_v20 = vpack.c.bf16 (!%p226_p2), %v301_v16, %v300_v15  ;;  %v303_v21 = vld [vmem:[%s2291_s1 + $0x38] sm:$0xff] (!%p226_p2)  ;;  %v320_v22 = vld [vmem:[%s2291_s1 + $0xc0] sm:$0xff] (!%p226_p2)  ;;  %v1322_v24 = vpack.c.bf16 (!%p226_p2), %v319_v18, %v318_v17  ;;  %v321_v28 = vld [vmem:[%s2291_s1 + $0xc8] sm:$0xff] (!%p226_p2) }
   0xb   : > { %v1593_v23 = vld [vmem:[%s2293_s3] sm:$0x1] (!%p226_p2)  ;;  %v1324_v33 = vpack.c.bf16 (!%p226_p2), %v303_v21, %v302_v19  ;;  %v1326_v37 = vpack.c.bf16 (!%p226_p2), %v321_v28, %v320_v22  ;;  %v305_v38 = vld [vmem:[%s2291_s1 + $0x48] sm:$0xff] (!%p226_p2)  ;;  %v322_v41 = vld [vmem:[%s2291_s1 + $0xd0] sm:$0xff] (!%p226_p2) }
   0xc   : > { %1228 = vmatprep.mubr.f32.mxu0 (!%p226_p2), %v1593_v23  ;;  %v1600_v26 = vld [vmem:[%s2294_s4] ss:$0 sm:$0xff] (!%p226_p2)  ;;  %v323_v42 = vld [vmem:[%s2291_s1 + $0xd8] sm:$0xff] (!%p226_p2)  ;;  %v306_v44 = vld [vmem:[%s2291_s1 + $0x50] sm:$0xff] (!%p226_p2) }
   0xd   : > { %s2298_s29 = smov (!%p262_p3, %s1184_s29), 31  ;;  %1349 = vmatpush3.bf16.msra.mxu1 %v1316_v13  ;;  %v304_v34 = vld [vmem:[%s2291_s1 + $0x40] sm:$0xff]  ;;  %v1330_v47 = vpack.c.bf16 %v323_v42, %v322_v41  ;;  %v307_v48 = vld [vmem:[%s2291_s1 + $0x58] sm:$0xff]  ;;  %v325_v52 = vld [vmem:[%s2291_s1 + $0xe8] sm:$0xff] }
   0xe   : > { %s1185_s20 = sshll.u32 %s2298_s29, 3  ;;  %1351 = vmatprep.subr.bf16.mxu1 %v1318_v14  ;;  %v1328_v43 = vpack.c.bf16 %v305_v38, %v304_v34  ;;  %v324_v51 = vld [vmem:[%s2291_s1 + $0xe0] sm:$0xff]  ;;  %v1332_v53 = vpack.c.bf16 %v307_v48, %v306_v44  ;;  %v309_v58 = vld [vmem:[%s2291_s1 + $0x68] sm:$0xff]  ;;  %v326_v61 = vld [vmem:[%s2291_s1 + $0xf0] sm:$0xff] }
   0xf   : > { %s1579_s9 = scalar_lea.vmem %s2290_s0, %s1185_s20  ;;  %v308_v54 = vld [vmem:[%s2291_s1 + $0x60] sm:$0xff]  ;;  %v1334_v57 = vpack.c.bf16 %v325_v52, %v324_v51  ;;  %v327_v62 = vld [vmem:[%s2291_s1 + $0xf8] sm:$0xff]  ;;  %v310_v0 = vld [vmem:[%s2291_s1 + $0x70] sm:$0xff]  ;;  %s2254_s17 = scalar_lea.vmem %s2296_s6, %s1185_s20 }
  0x10   : > { %v282_v25 = vld [vmem:[%s1579_s9 + $0x10] sm:$0xff]  ;;  %v280_v27 = vld [vmem:[%s1579_s9] sm:$0xff]  ;;  %v283_v31 = vld [vmem:[%s1579_s9 + $0x18] sm:$0xff]  ;;  %v1336_v63 = vpack.c.bf16 %v309_v58, %v308_v54  ;;  %v1338_v3 = vpack.c.bf16 %v327_v62, %v326_v61 }
  0x11   : > { %1317 = vmatpush3.bf16.xpose.msra.mxu0 %v1316_v13  ;;  %v337_v29 = vmul.f32 %v1600_v26, %v282_v25  ;;  %v335_v30 = vmul.f32 %v1600_v26, %v280_v27  ;;  %v281_v32 = vld [vmem:[%s1579_s9 + $0x8] sm:$0xff]  ;;  %1353 = vmatpush3.bf16.msra.mxu1 %v1320_v20  ;;  %v338_v35 = vmul.f32 %v1600_v26, %v283_v31  ;;  %v284_v40 = vld [vmem:[%s1579_s9 + $0x20] sm:$0xff]  ;;  %v287_v49 = vld [vmem:[%s1579_s9 + $0x38] sm:$0xff] }
  0x12   : > { %1319 = vmatprep.subr.bf16.mxu0 %v1318_v14  ;;  %1355 = vmatprep.subr.bf16.mxu1 %v1322_v24  ;;  %v336_v36 = vmul.f32 %v1600_v26, %v281_v32  ;;  %v285_v39 = vld [vmem:[%s1579_s9 + $0x28] sm:$0xff]  ;;  %v339_v46 = vmul.f32 %v1600_v26, %v284_v40  ;;  %v286_v50 = vld [vmem:[%s1579_s9 + $0x30] sm:$0xff]  ;;  %v342_v55 = vmul.f32 %v1600_v26, %v287_v49  ;;  %v288_v60 = vld [vmem:[%s1579_s9 + $0x40] sm:$0xff] }
  0x13   : > { %355 = vadd.xlane.f32.xlu1 %v337_v29  ;;  %351 = vadd.xlane.f32.xlu0 %v335_v30  ;;  %v340_v45 = vmul.f32 %v1600_v26, %v285_v39  ;;  %v341_v56 = vmul.f32 %v1600_v26, %v286_v50  ;;  %v289_v59 = vld [vmem:[%s1579_s9 + $0x48] sm:$0xff]  ;;  %v343_v2 = vmul.f32 %v1600_v26, %v288_v60  ;;  %v311_v4 = vld [vmem:[%s2291_s1 + $0x78] sm:$0xff]  ;;  %v290_v6 = vld [vmem:[%s1579_s9 + $0x50] sm:$0xff]  ;;  %v455_v30 = vlaneseq }
  0x14   : > { %v344_v1 = vmul.f32 %v1600_v26, %v289_v59  ;;  %v291_v5 = vld [vmem:[%s1579_s9 + $0x58] sm:$0xff]  ;;  %v1340_v7 = vpack.c.bf16 %v311_v4, %v310_v0  ;;  %v345_v9 = vmul.f32 %v1600_v26, %v290_v6  ;;  %v293_v10 = vld [vmem:[%s1579_s9 + $0x68] sm:$0xff]  ;;  %v292_v11 = vld [vmem:[%s1579_s9 + $0x60] sm:$0xff] }
  0x15   : > { %1357 = vmatpush3.bf16.msra.mxu1 %v1324_v33  ;;  %v346_v8 = vmul.f32 %v1600_v26, %v291_v5  ;;  %v348_v12 = vmul.f32 %v1600_v26, %v293_v10  ;;  %v347_v13 = vmul.f32 %v1600_v26, %v292_v11  ;;  %v295_v14 = vld [vmem:[%s1579_s9 + $0x78] sm:$0xff]  ;;  %v294_v15 = vld [vmem:[%s1579_s9 + $0x70] sm:$0xff]  ;;  %s1195_s9 = sshll.u32 %s2298_s29, 4  ;;  %v456_v32 = vshrl.u32 %v455_v30, 7 }
  0x16   : > { %1359 = vmatprep.subr.bf16.mxu1 %v1326_v37  ;;  %v350_v16 = vmul.f32 %v1600_v26, %v295_v14  ;;  %v349_v17 = vmul.f32 %v1600_v26, %v294_v15  ;;  %s1707_s12 = scalar_lea.vmem %s2292_s2, %s1195_s9 }
  0x17   : > { %357 = vadd.xlane.f32.xlu1 %v338_v35  ;;  %353 = vadd.xlane.f32.xlu0 %v336_v36  ;;  %v457_v34 = vsub.s32 0, %v456_v32  ;;  %v591_v35 = vld [vmem:[%s1707_s12] sm:$0xff]  ;;  %v593_v38 = vld [vmem:[%s1707_s12 + $0x10] sm:$0xff]  ;;  %v594_v39 = vld [vmem:[%s1707_s12 + $0x18] sm:$0xff] }
  0x18   : > { %v1714_v42 = vld [vmem:[%s1707_s12 + $0x20] sm:$0xff]  ;;  %vm623_vm0 = vcmp.gt.f32.partialorder %v591_v35, 0.5  ;;  %vm625_vm2 = vcmp.gt.f32.partialorder %v593_v38, 0.5  ;;  %vm626_vm3 = vcmp.gt.f32.partialorder %v594_v39, 0.5  ;;  %v1727_v48 = vld [vmem:[%s1707_s12 + $0x38] sm:$0xff] }
  0x19   : > { %1321 = vmatpush3.bf16.xpose.msra.mxu0 %v1320_v20  ;;  %1361 = vmatpush3.bf16.msra.mxu1 %v1328_v43  ;;  %vm627_vm4 = vcmp.gt.f32.partialorder %v1714_v42, 0.5  ;;  %v1751_v58 = vld [vmem:[%s1707_s12 + $0x58] sm:$0xff]  ;;  %vm630_vm9 = vcmp.gt.f32.partialorder %v1727_v48, 0.5  ;;  %v1762_v61 = vld [vmem:[%s1707_s12 + $0x40] sm:$0xff] }
  0x1a   : > { %1323 = vmatprep.subr.bf16.mxu0 %v1322_v24  ;;  %1363 = vmatprep.subr.bf16.mxu1 %v1330_v47  ;;  %vm634_vm14 = vcmp.gt.f32.partialorder %v1751_v58, 0.5  ;;  %vm631_vm15 = vcmp.gt.f32.partialorder %v1762_v61, 0.5 }
  0x1b   : > { %361 = vadd.xlane.f32.xlu1 %v340_v45  ;;  %359 = vadd.xlane.f32.xlu0 %v339_v46  ;;  %v1719_v45 = vld [vmem:[%s1707_s12 + $0x28] sm:$0xff] }
  0x1c   : > { %vm628_vm5 = vcmp.gt.f32.partialorder %v1719_v45, 0.5 }
  0x1d   : > { %1365 = vmatpush3.bf16.msra.mxu1 %v1332_v53 }
  0x1e   : > { %1367 = vmatprep.subr.bf16.mxu1 %v1334_v57 }
  0x1f   : > { %365 = vadd.xlane.f32.xlu1 %v342_v55  ;;  %363 = vadd.xlane.f32.xlu0 %v341_v56 }
  0x21   : > { %1325 = vmatpush3.bf16.xpose.msra.mxu0 %v1324_v33  ;;  %1369 = vmatpush3.bf16.msra.mxu1 %v1336_v63 }
  0x22   : > { %1327 = vmatprep.subr.bf16.mxu0 %v1326_v37  ;;  %1371 = vmatprep.subr.bf16.mxu1 %v1338_v3  ;;  %v592_v37 = vld [vmem:[%s1707_s12 + $0x8] sm:$0xff] }
  0x23   : > { %369 = vadd.xlane.f32.xlu1 %v344_v1  ;;  %367 = vadd.xlane.f32.xlu0 %v343_v2  ;;  %vm624_vm1 = vcmp.gt.f32.partialorder %v592_v37, 0.5  ;;  %v1814_v37 = vld [vmem:[%s1707_s12 + $0x60] sm:$0xff] }
  0x25   : > { %1373 = vmatpush3.bf16.msra.mxu1 %v1340_v7 }
  0x27   : > { %373 = vadd.xlane.f32.xlu1 %v346_v8  ;;  %371 = vadd.xlane.f32.xlu0 %v345_v9  ;;  %v1779_v8 = vld [vmem:[%s1707_s12 + $0x48] sm:$0xff] }
  0x29   : > { %1329 = vmatpush3.bf16.xpose.msra.mxu0 %v1328_v43 }
  0x2a   : > { %1331 = vmatprep.subr.bf16.mxu0 %v1330_v47  ;;  %v1724_v47 = vld [vmem:[%s1707_s12 + $0x30] sm:$0xff] }
  0x2b   : > { %377 = vadd.xlane.f32.xlu1 %v348_v12  ;;  %375 = vadd.xlane.f32.xlu0 %v347_v13  ;;  %vm629_vm8 = vcmp.gt.f32.partialorder %v1724_v47, 0.5  ;;  %v1786_v12 = vld [vmem:[%s1707_s12 + $0x70] sm:$0xff] }
  0x2f   : > { %381 = vadd.xlane.f32.xlu1 %v350_v16  ;;  %379 = vadd.xlane.f32.xlu0 %v349_v17 }
  0x31   : > { %1333 = vmatpush3.bf16.xpose.msra.mxu0 %v1332_v53 }
  0x32   : > { %1335 = vmatprep.subr.bf16.mxu0 %v1334_v57  ;;  %v1748_v57 = vld [vmem:[%s1707_s12 + $0x50] sm:$0xff] }
  0x33   : > { %vm633_vm13 = vcmp.gt.f32.partialorder %v1748_v57, 0.5  ;;  %v1885_v57 = vld [vmem:[%s1707_s12 + $0xb0] sm:$0xff] }
  0x39   : > { %1337 = vmatpush3.bf16.xpose.msra.mxu0 %v1336_v63 }
  0x3a   : > { %1339 = vmatprep.subr.bf16.mxu0 %v1338_v3 }
  0x41   : > { %1341 = vmatpush3.bf16.xpose.msra.mxu0 %v1340_v7 }
  0x48   : > { %1229 = vmatmul.mubr.f32.vlgmr.msra.gmra.mrb[0].mxu0 %v1593_v23 }
  0xa0   : > { %v1679_v18 = vpop.xlane.xlu1 %355  ;;  %v352_v19 = vpop.xlane.xlu0 %351 }
  0xa4   : > { %v1681_v20 = vpop.xlane.xlu1 %357  ;;  %v354_v21 = vpop.xlane.xlu0 %353 }
  0xa8   : > { %v1683_v22 = vpop.xlane.xlu1 %361  ;;  %v1685_v24 = vpop.xlane.xlu0 %359 }
  0xac   : > { %v1687_v25 = vpop.xlane.xlu1 %365  ;;  %v1689_v26 = vpop.xlane.xlu0 %363 }
  0xb0   : > { %v1691_v27 = vpop.xlane.xlu1 %369  ;;  %v1693_v28 = vpop.xlane.xlu0 %367 }
  0xb4   : > { %v1695_v29 = vpop.xlane.xlu1 %373  ;;  %v1697_v23 = vpop.xlane.xlu0 %371 }
  0xb8   : > { %v1700_v31 = vpop.xlane.xlu1 %377  ;;  %v1702_v33 = vpop.xlane.xlu0 %375 }
  0xbc   : > { %v382_v36 = vpop.xlane.xlu1 %381  ;;  %v380_v41 = vpop.xlane.xlu0 %379 }
 0x11b   : > { %v450_v40 = vpop.f32.mrb[0].mxu0 }
 0x11c   : > { %v1716_v43 = vrot.slane %v450_v40, %v457_v34  ;;  %v452_v44 = vpop.f32.mrb[1].mxu0 }
 0x11d   : > { %v1721_v46 = vrot.slane %v452_v44, %v457_v34 }
 0x11e   : > { %v1730_v49 = vadd.f32 %v1716_v43, %v382_v36  ;;  %v1733_v50 = vadd.f32 %v1716_v43, %v380_v41  ;;  %v463_v51 = vadd.f32 %v1716_v43, %v352_v19  ;;  %v465_v52 = vadd.f32 %v1716_v43, %v354_v21 }
 0x11f   : > { %v1739_v53 = vadd.f32 %v1721_v46, %v382_v36  ;;  %v1742_v54 = vadd.f32 %v1721_v46, %v380_v41  ;;  %v464_v55 = vadd.f32 %v1721_v46, %v352_v19  ;;  %v466_v56 = vadd.f32 %v1721_v46, %v354_v21 }
 0x120   : > { %v1754_v59 = vmul.f32 0.2, %v1730_v49  ;;  %v1757_v60 = vmul.f32 0.2, %v1733_v50  ;;  %vm495_vm6 = vcmp.gt.f32.partialorder %v463_v51, 0.0  ;;  %vm497_vm7 = vcmp.gt.f32.partialorder %v465_v52, 0.0 }
 0x121   : > { %v1765_v62 = vmul.f32 0.2, %v1739_v53  ;;  %v1768_v63 = vmul.f32 0.2, %v1742_v54  ;;  %vm496_vm10 = vcmp.gt.f32.partialorder %v464_v55, 0.0  ;;  %vm498_vm11 = vcmp.gt.f32.partialorder %v466_v56, 0.0 }
 0x122   : > { %v527_v0 = vmul.f32 0.2, %v463_v51  ;;  %v528_v1 = vmul.f32 0.2, %v464_v55  ;;  %v529_v2 = vmul.f32 0.2, %v465_v52  ;;  %v467_v3 = vadd.f32 %v1716_v43, %v1679_v18 }
 0x123   : > { %v530_v4 = vmul.f32 0.2, %v466_v56  ;;  %v468_v5 = vadd.f32 %v1721_v46, %v1679_v18  ;;  %v469_v6 = vadd.f32 %v1716_v43, %v1681_v20  ;;  %v470_v7 = vadd.f32 %v1721_v46, %v1681_v20  ;;  %v1806_v20 = vld [vmem:[%s1707_s12 + $0x78] sm:$0xff] }
 0x124   : > { %v559_v9 = vsel %vm495_vm6, %v463_v51, %v527_v0  ;;  %v560_v10 = vsel %vm496_vm10, %v464_v55, %v528_v1  ;;  %v561_v11 = vsel %vm497_vm7, %v465_v52, %v529_v2  ;;  %vm499_vm12 = vcmp.gt.f32.partialorder %v467_v3, 0.0  ;;  %v1833_v52 = vld [vmem:[%s1707_s12 + $0x68] sm:$0xff]  ;;  %v1836_v55 = vld [vmem:[%s1707_s12 + $0x90] sm:$0xff]  ;;  %v1850_v0 = vld [vmem:[%s1707_s12 + $0x98] sm:$0xff] }
 0x125   : > { %v1789_v13 = vsel %vm623_vm0, %v559_v9, -1e+30  ;;  %v1792_v14 = vsel %vm624_vm1, %v560_v10, -1e+30  ;;  %v562_v15 = vsel %vm498_vm11, %v466_v56, %v530_v4  ;;  %v1796_v16 = vsel %vm625_vm2, %v561_v11, -1e+30 }
 0x126   : > { %v687_v17 = vmax.f32 %v1789_v13, %v1792_v14  ;;  %v1802_v18 = vsel %vm626_vm3, %v562_v15, -1e+30  ;;  %vm500_vm6 = vcmp.gt.f32.partialorder %v468_v5, 0.0  ;;  %v531_v19 = vmul.f32 0.2, %v467_v3  ;;  %v1865_v9 = vld [vmem:[%s1707_s12 + $0x80] sm:$0xff] }
 0x127   : > { %vm632_vm0 = vcmp.gt.f32.partialorder %v1779_v8, 0.5  ;;  %v690_v21 = vmax.f32 %v1796_v16, %v1802_v18  ;;  %v532_v30 = vmul.f32 0.2, %v468_v5  ;;  %vm501_vm1 = vcmp.gt.f32.partialorder %v469_v6, 0.0  ;;  %v1876_v15 = vld [vmem:[%s1707_s12 + $0x88] sm:$0xff] }
 0x128   : > { %vm502_vm2 = vcmp.gt.f32.partialorder %v470_v7, 0.0  ;;  %688 = vmax.xlane.f32.xlu0 %v687_v17  ;;  %v563_v32 = vsel %vm499_vm12, %v467_v3, %v531_v19  ;;  %v533_v34 = vmul.f32 0.2, %v469_v6  ;;  %v534_v35 = vmul.f32 0.2, %v470_v7 }
 0x129   : > { %v473_v36 = vadd.f32 %v1716_v43, %v1683_v22  ;;  %691 = vmax.xlane.f32.xlu1 %v690_v21  ;;  %v564_v38 = vsel %vm500_vm6, %v468_v5, %v532_v30  ;;  %v1818_v39 = vsel %vm627_vm4, %v563_v32, -1e+30  ;;  %v474_v40 = vadd.f32 %v1721_v46, %v1683_v22  ;;  %v1888_v30 = vld [vmem:[%s1707_s12 + $0xb8] sm:$0xff] }
 0x12a   : > { %v471_v41 = vadd.f32 %v1716_v43, %v1685_v24  ;;  %vm637_vm3 = vcmp.gt.f32.partialorder %v1786_v12, 0.5  ;;  %vm638_vm7 = vcmp.gt.f32.partialorder %v1806_v20, 0.5  ;;  %v1828_v44 = vsel %vm628_vm5, %v564_v38, -1e+30 }
 0x12b   : > { %v565_v51 = vsel %vm501_vm1, %v469_v6, %v533_v34  ;;  %v566_v42 = vsel %vm502_vm2, %v470_v7, %v534_v35  ;;  %vm505_vm4 = vcmp.gt.f32.partialorder %v473_v36, 0.0  ;;  %v693_v22 = vmax.f32 %v1818_v39, %v1828_v44 }
 0x12c   : > { %v1842_v56 = vsel %vm629_vm8, %v565_v51, -1e+30  ;;  %v1846_v45 = vsel %vm630_vm9, %v566_v42, -1e+30  ;;  %vm506_vm5 = vcmp.gt.f32.partialorder %v474_v40, 0.0  ;;  %vm635_vm10 = vcmp.gt.f32.partialorder %v1814_v37, 0.5 }
 0x12d   : > { %v696_v1 = vmax.f32 %v1842_v56, %v1846_v45  ;;  %v537_v2 = vmul.f32 0.2, %v473_v36  ;;  %v538_v3 = vmul.f32 0.2, %v474_v40  ;;  %v472_v47 = vadd.f32 %v1721_v46, %v1685_v24  ;;  %694 = vmax.xlane.f32.xlu0 %v693_v22  ;;  %v1913_v42 = vld [vmem:[%s1707_s12 + $0xa8] sm:$0xff] }
 0x12e   : > { %vm503_vm8 = vcmp.gt.f32.partialorder %v471_v41, 0.0  ;;  %v535_v4 = vmul.f32 0.2, %v471_v41  ;;  %v477_v48 = vadd.f32 %v1716_v43, %v1687_v25  ;;  %v478_v5 = vadd.f32 %v1721_v46, %v1687_v25 }
 0x12f   : > { %vm636_vm9 = vcmp.gt.f32.partialorder %v1833_v52, 0.5  ;;  %697 = vmax.xlane.f32.xlu1 %v696_v1  ;;  %v569_v6 = vsel %vm505_vm4, %v473_v36, %v537_v2  ;;  %v570_v7 = vsel %vm506_vm5, %v474_v40, %v538_v3  ;;  %vm504_vm11 = vcmp.gt.f32.partialorder %v472_v47, 0.0 }
 0x130   : > { %v536_v24 = vmul.f32 0.2, %v472_v47  ;;  %vm641_vm12 = vcmp.gt.f32.partialorder %v1836_v55, 0.5  ;;  %vm642_vm6 = vcmp.gt.f32.partialorder %v1850_v0, 0.5  ;;  %v1869_v10 = vsel %vm633_vm13, %v569_v6, -1e+30 }
 0x131   : > { %v1873_v25 = vsel %vm634_vm14, %v570_v7, -1e+30  ;;  %v567_v11 = vsel %vm503_vm8, %v471_v41, %v535_v4  ;;  %vm509_vm1 = vcmp.gt.f32.partialorder %v477_v48, 0.0  ;;  %vm510_vm2 = vcmp.gt.f32.partialorder %v478_v5, 0.0  ;;  %v1981_v0 = vld [vmem:[%s1707_s12 + $0xe0] sm:$0xff] }
 0x132   : > { %v702_v17 = vmax.f32 %v1869_v10, %v1873_v25  ;;  %v568_v19 = vsel %vm504_vm11, %v472_v47, %v536_v24  ;;  %v1882_v21 = vsel %vm631_vm15, %v567_v11, -1e+30  ;;  %v541_v32 = vmul.f32 0.2, %v477_v48  ;;  %v1926_v47 = vld [vmem:[%s1707_s12 + $0xd0] sm:$0xff]  ;;  %v1943_v24 = vld [vmem:[%s1707_s12 + $0xd8] sm:$0xff] }
 0x133   : > { %v1892_v58 = vsel %vm632_vm0, %v568_v19, -1e+30  ;;  %v542_v34 = vmul.f32 0.2, %v478_v5  ;;  %v475_v35 = vadd.f32 %v1716_v43, %v1689_v26  ;;  %v476_v36 = vadd.f32 %v1721_v46, %v1689_v26  ;;  %v1910_v26 = vld [vmem:[%s1707_s12 + $0xa0] sm:$0xff] }
 0x134   : > { %703 = vmax.xlane.f32.xlu1 %v702_v17  ;;  %v699_v61 = vmax.f32 %v1882_v21, %v1892_v58  ;;  %v481_v38 = vadd.f32 %v1716_v43, %v1691_v27  ;;  %v482_v8 = vadd.f32 %v1721_v46, %v1691_v27  ;;  %vm639_vm13 = vcmp.gt.f32.partialorder %v1865_v9, 0.5  ;;  %v1953_v19 = vld [vmem:[%s1707_s12 + $0xc0] sm:$0xff] }
 0x135   : > { %vm640_vm14 = vcmp.gt.f32.partialorder %v1876_v15, 0.5  ;;  %v573_v40 = vsel %vm509_vm1, %v477_v48, %v541_v32  ;;  %v574_v41 = vsel %vm510_vm2, %v478_v5, %v542_v34  ;;  %vm507_vm15 = vcmp.gt.f32.partialorder %v475_v35, 0.0  ;;  %v1959_v32 = vld [vmem:[%s1707_s12 + $0xf0] sm:$0xff] }
 0x136   : > { %v539_v51 = vmul.f32 0.2, %v475_v35  ;;  %vm645_vm0 = vcmp.gt.f32.partialorder %v1885_v57, 0.5  ;;  %vm646_vm4 = vcmp.gt.f32.partialorder %v1888_v30, 0.5  ;;  %700 = vmax.xlane.f32.xlu0 %v699_v61  ;;  %v1917_v27 = vsel %vm637_vm3, %v573_v40, -1e+30 }
 0x137   : > { %v1921_v22 = vsel %vm638_vm7, %v574_v41, -1e+30  ;;  %vm508_vm5 = vcmp.gt.f32.partialorder %v476_v36, 0.0  ;;  %vm513_vm8 = vcmp.gt.f32.partialorder %v481_v38, 0.0  ;;  %v540_v2 = vmul.f32 0.2, %v476_v36 }
 0x138   : > { %v708_v1 = vmax.f32 %v1917_v27, %v1921_v22  ;;  %v571_v3 = vsel %vm507_vm15, %v475_v35, %v539_v51  ;;  %vm514_vm11 = vcmp.gt.f32.partialorder %v482_v8, 0.0  ;;  %v545_v4 = vmul.f32 0.2, %v481_v38  ;;  %v1972_v61 = vld [vmem:[%s1707_s12 + $0xf8] sm:$0xff] }
 0x139   : > { %v1930_v12 = vsel %vm635_vm10, %v571_v3, -1e+30  ;;  %v546_v20 = vmul.f32 0.2, %v482_v8  ;;  %v479_v48 = vadd.f32 %v1716_v43, %v1693_v28  ;;  %v572_v5 = vsel %vm508_vm5, %v476_v36, %v540_v2 }
 0x13a   : > { %709 = vmax.xlane.f32.xlu1 %v708_v1  ;;  %v480_v6 = vadd.f32 %v1721_v46, %v1693_v28  ;;  %v485_v7 = vadd.f32 %v1716_v43, %v1695_v29  ;;  %v486_v37 = vadd.f32 %v1721_v46, %v1695_v29  ;;  %vm643_vm3 = vcmp.gt.f32.partialorder %v1910_v26, 0.5  ;;  %v1956_v29 = vld [vmem:[%s1707_s12 + $0xc8] sm:$0xff] }
 0x13b   : > { %vm644_vm7 = vcmp.gt.f32.partialorder %v1913_v42, 0.5  ;;  %v1947_v11 = vsel %vm636_vm9, %v572_v5, -1e+30  ;;  %v577_v17 = vsel %vm513_vm8, %v481_v38, %v545_v4  ;;  %v578_v28 = vsel %vm514_vm11, %v482_v8, %v546_v20  ;;  %v620_v4 = vld [vmem:[%s1707_s12 + $0xe8] sm:$0xff] }
 0x13c   : > { %vm511_vm10 = vcmp.gt.f32.partialorder %v479_v48, 0.0  ;;  %vm649_vm1 = vcmp.gt.f32.partialorder %v1926_v47, 0.5  ;;  %v705_v34 = vmax.f32 %v1930_v12, %v1947_v11  ;;  %v1965_v52 = vsel %vm641_vm12, %v577_v17, -1e+30 }
 0x13d   : > { %v1969_v35 = vsel %vm642_vm6, %v578_v28, -1e+30  ;;  %vm512_vm9 = vcmp.gt.f32.partialorder %v480_v6, 0.0  ;;  %v543_v38 = vmul.f32 0.2, %v479_v48  ;;  %vm517_vm2 = vcmp.gt.f32.partialorder %v485_v7, 0.0 }
 0x13e   : > { %v714_v36 = vmax.f32 %v1965_v52, %v1969_v35  ;;  %v544_v8 = vmul.f32 0.2, %v480_v6  ;;  %706 = vmax.xlane.f32.xlu0 %v705_v34  ;;  %vm518_vm15 = vcmp.gt.f32.partialorder %v486_v37, 0.0  ;;  %v549_v55 = vmul.f32 0.2, %v485_v7 }
 0x13f   : > { %v550_v40 = vmul.f32 0.2, %v486_v37  ;;  %v483_v41 = vadd.f32 %v1716_v43, %v1697_v23  ;;  %vm650_vm12 = vcmp.gt.f32.partialorder %v1943_v24, 0.5  ;;  %vm653_vm6 = vcmp.gt.f32.partialorder %v1959_v32, 0.5 }
 0x140   : > { %715 = vmax.xlane.f32.xlu1 %v714_v36  ;;  %v575_v51 = vsel %vm511_vm10, %v479_v48, %v543_v38  ;;  %v576_v1 = vsel %vm512_vm9, %v480_v6, %v544_v8  ;;  %v484_v2 = vadd.f32 %v1721_v46, %v1697_v23  ;;  %v489_v3 = vadd.f32 %v1716_v43, %v1700_v31 }
 0x141   : > { %vm647_vm5 = vcmp.gt.f32.partialorder %v1953_v19, 0.5  ;;  %vm648_vm8 = vcmp.gt.f32.partialorder %v1956_v29, 0.5  ;;  %vm654_vm11 = vcmp.gt.f32.partialorder %v1972_v61, 0.5  ;;  %v1995_v20 = vsel %vm639_vm13, %v575_v51, -1e+30 }
 0x142   : > { %v1999_v48 = vsel %vm640_vm14, %v576_v1, -1e+30  ;;  %v581_v23 = vsel %vm517_vm2, %v485_v7, %v549_v55  ;;  %v582_v5 = vsel %vm518_vm15, %v486_v37, %v550_v40  ;;  %vm515_vm13 = vcmp.gt.f32.partialorder %v483_v41, 0.0 }
 0x143   : > { %v711_v6 = vmax.f32 %v1995_v20, %v1999_v48  ;;  %v2007_v17 = vsel %vm645_vm0, %v581_v23, -1e+30  ;;  %v2011_v9 = vsel %vm646_vm4, %v582_v5, -1e+30  ;;  %vm651_vm10 = vcmp.gt.f32.partialorder %v1981_v0, 0.5 }
 0x144   : > { %v720_v15 = vmax.f32 %v2007_v17, %v2011_v9  ;;  %vm516_vm14 = vcmp.gt.f32.partialorder %v484_v2, 0.0  ;;  %v547_v7 = vmul.f32 0.2, %v483_v41  ;;  %v548_v37 = vmul.f32 0.2, %v484_v2 }
 0x145   : > { %vm652_vm9 = vcmp.gt.f32.partialorder %v620_v4, 0.5  ;;  %712 = vmax.xlane.f32.xlu0 %v711_v6  ;;  %v490_v57 = vadd.f32 %v1721_v46, %v1700_v31  ;;  %vm521_vm0 = vcmp.gt.f32.partialorder %v489_v3, 0.0  ;;  %v553_v28 = vmul.f32 0.2, %v489_v3 }
 0x146   : > { %v487_v30 = vadd.f32 %v1716_v43, %v1702_v33  ;;  %721 = vmax.xlane.f32.xlu1 %v720_v15  ;;  %v579_v34 = vsel %vm515_vm13, %v483_v41, %v547_v7  ;;  %v580_v36 = vsel %vm516_vm14, %v484_v2, %v548_v37  ;;  %v488_v38 = vadd.f32 %v1721_v46, %v1702_v33 }
 0x147   : > { %vm525_vm4 = vcmp.gt.f32.partialorder %v1730_v49, 0.0  ;;  %v2025_v8 = vsel %vm643_vm3, %v579_v34, -1e+30  ;;  %v2029_v31 = vsel %vm644_vm7, %v580_v36, -1e+30  ;;  %vm522_vm2 = vcmp.gt.f32.partialorder %v490_v57, 0.0 }
 0x148   : > { %v585_v55 = vsel %vm521_vm0, %v489_v3, %v553_v28  ;;  %v717_v43 = vmax.f32 %v2025_v8, %v2029_v31  ;;  %v554_v40 = vmul.f32 0.2, %v490_v57  ;;  %vm519_vm15 = vcmp.gt.f32.partialorder %v487_v30, 0.0 }
 0x149   : > { %v2035_v41 = vsel %vm649_vm1, %v585_v55, -1e+30  ;;  %vm520_vm13 = vcmp.gt.f32.partialorder %v488_v38, 0.0  ;;  %v551_v33 = vmul.f32 0.2, %v487_v30  ;;  %vm526_vm3 = vcmp.gt.f32.partialorder %v1739_v53, 0.0 }
 0x14a   : > { %v552_v46 = vmul.f32 0.2, %v488_v38  ;;  %718 = vmax.xlane.f32.xlu0 %v717_v43  ;;  %v586_v26 = vsel %vm522_vm2, %v490_v57, %v554_v40  ;;  %v589_v42 = vsel %vm525_vm4, %v1730_v49, %v1754_v59  ;;  %v590_v51 = vsel %vm526_vm3, %v1739_v53, %v1765_v62 }
 0x14b   : > { %vm523_vm7 = vcmp.gt.f32.partialorder %v1733_v50, 0.0  ;;  %v2045_v47 = vsel %vm650_vm12, %v586_v26, -1e+30  ;;  %v583_v1 = vsel %vm519_vm15, %v487_v30, %v551_v33  ;;  %v2049_v3 = vsel %vm653_vm6, %v589_v42, -1e+30 }
 0x14c   : > { %v584_v2 = vsel %vm520_vm13, %v488_v38, %v552_v46  ;;  %v726_v23 = vmax.f32 %v2035_v41, %v2045_v47  ;;  %v2055_v49 = vsel %vm647_vm5, %v583_v1, -1e+30  ;;  %v2063_v59 = vsel %vm654_vm11, %v590_v51, -1e+30 }
 0x14d   : > { %v2059_v53 = vsel %vm648_vm8, %v584_v2, -1e+30  ;;  %vm524_vm1 = vcmp.gt.f32.partialorder %v1742_v54, 0.0  ;;  %v587_v24 = vsel %vm523_vm7, %v1733_v50, %v1757_v60  ;;  %v732_v61 = vmax.f32 %v2049_v3, %v2063_v59 }
 0x14e   : > { %v723_v62 = vmax.f32 %v2055_v49, %v2059_v53  ;;  %727 = vmax.xlane.f32.xlu1 %v726_v23  ;;  %v588_v19 = vsel %vm524_vm1, %v1742_v54, %v1768_v63  ;;  %v2074_v29 = vsel %vm651_vm10, %v587_v24, -1e+30 }
 0x14f   : > { %v2077_v32 = vsel %vm652_vm9, %v588_v19, -1e+30 }
 0x150   : > { %724 = vmax.xlane.f32.xlu0 %v723_v62  ;;  %v729_v5 = vmax.f32 %v2074_v29, %v2077_v32 }
 0x152   : > { %733 = vmax.xlane.f32.xlu1 %v732_v61 }
 0x154   : > { %730 = vmax.xlane.f32.xlu0 %v729_v5 }
 0x1b5   : > { %v689_v50 = vpop.xlane.xlu0 %688 }
 0x1b6   : > { %v692_v60 = vpop.xlane.xlu1 %691  ;;  %v735_v54 = vsub.f32 %v1789_v13, %v689_v50  ;;  %v736_v63 = vsub.f32 %v1792_v14, %v689_v50 }
 0x1b7   : > { %v737_v0 = vsub.f32 %v1796_v16, %v692_v60  ;;  %v738_v4 = vsub.f32 %v1802_v18, %v692_v60 }
 0x1b8   : > { %v767_v6 = vmul.f32 1.442695, %v735_v54  ;;  %v769_v37 = vmul.f32 1.442695, %v736_v63 }
 0x1b9   : > { %v771_v15 = vmul.f32 1.442695, %v737_v0  ;;  %v773_v7 = vmul.f32 1.442695, %v738_v4 }
 0x1ba   : > { %1382 = vpow2.f32 %v767_v6  ;;  %v695_v57 = vpop.xlane.xlu0 %694 }
 0x1bb   : > { %1384 = vpow2.f32 %v771_v15  ;;  %v739_v30 = vsub.f32 %v1818_v39, %v695_v57  ;;  %v740_v34 = vsub.f32 %v1828_v44, %v695_v57 }
 0x1bc   : > { %v698_v28 = vpop.xlane.xlu1 %697  ;;  %1386 = vpow2.f32 %v773_v7 }
 0x1bd   : > { %v741_v13 = vsub.f32 %v1842_v56, %v698_v28  ;;  %v742_v14 = vsub.f32 %v1846_v45, %v698_v28  ;;  %1388 = vpow2.f32 %v769_v37  ;;  %v775_v16 = vmul.f32 1.442695, %v739_v30 }
 0x1be   : > { %v777_v38 = vmul.f32 1.442695, %v740_v34 }
 0x1bf   : > { %v779_v18 = vmul.f32 1.442695, %v741_v13  ;;  %v781_v36 = vmul.f32 1.442695, %v742_v14  ;;  %1390 = vpow2.f32 %v775_v16 }
 0x1c1   : > { %v704_v55 = vpop.xlane.xlu1 %703  ;;  %1392 = vpow2.f32 %v779_v18 }
 0x1c2   : > { %v745_v43 = vsub.f32 %v1869_v10, %v704_v55  ;;  %v746_v40 = vsub.f32 %v1873_v25, %v704_v55  ;;  %1394 = vpow2.f32 %v781_v36 }
 0x1c3   : > { %v701_v39 = vpop.xlane.xlu0 %700  ;;  %1396 = vpow2.f32 %v777_v38 }
 0x1c4   : > { %v787_v44 = vmul.f32 1.442695, %v745_v43  ;;  %v789_v33 = vmul.f32 1.442695, %v746_v40  ;;  %v743_v56 = vsub.f32 %v1882_v21, %v701_v39  ;;  %v744_v45 = vsub.f32 %v1892_v58, %v701_v39  ;;  %v2095_v46 = vpop.eup %1382 }
 0x1c5   : > { %v2097_v51 = vpop.eup %1384 }
 0x1c6   : > { %1398 = vpow2.f32 %v787_v44  ;;  %v783_v26 = vmul.f32 1.442695, %v743_v56  ;;  %v785_v10 = vmul.f32 1.442695, %v744_v45  ;;  %v2101_v2 = vpop.eup %1386 }
 0x1c7   : > { %v710_v42 = vpop.xlane.xlu1 %709  ;;  %1400 = vpow2.f32 %v789_v33  ;;  %v2103_v23 = vpop.eup %1388  ;;  %v834_v62 = vadd.f32 %v2101_v2, %v2097_v51 }
 0x1c8   : > { %v749_v25 = vsub.f32 %v1917_v27, %v710_v42  ;;  %v750_v1 = vsub.f32 %v1921_v22, %v710_v42  ;;  %1402 = vpow2.f32 %v783_v26  ;;  %v831_v19 = vadd.f32 %v2103_v23, %v2095_v46 }
 0x1c9   : > { %1404 = vpow2.f32 %v785_v10  ;;  %v2109_v61 = vpop.eup %1390  ;;  %835 = vadd.xlane.f32.xlu1 %v834_v62 }
 0x1ca   : > { %v795_v21 = vmul.f32 1.442695, %v749_v25  ;;  %v797_v58 = vmul.f32 1.442695, %v750_v1  ;;  %832 = vadd.xlane.f32.xlu0 %v831_v19 }
 0x1cb   : > { %v707_v24 = vpop.xlane.xlu0 %706  ;;  %v2113_v50 = vpop.eup %1392 }
 0x1cc   : > { %1406 = vpow2.f32 %v795_v21  ;;  %v747_v27 = vsub.f32 %v1930_v12, %v707_v24  ;;  %v748_v22 = vsub.f32 %v1947_v11, %v707_v24  ;;  %v2117_v63 = vpop.eup %1394 }
 0x1cd   : > { %v716_v5 = vpop.xlane.xlu1 %715  ;;  %1408 = vpow2.f32 %v797_v58  ;;  %v2119_v6 = vpop.eup %1396  ;;  %v840_v11 = vadd.f32 %v2117_v63, %v2113_v50 }
 0x1ce   : > { %v753_v60 = vsub.f32 %v1965_v52, %v716_v5  ;;  %v754_v54 = vsub.f32 %v1969_v35, %v716_v5  ;;  %v791_v0 = vmul.f32 1.442695, %v747_v27  ;;  %v793_v4 = vmul.f32 1.442695, %v748_v22 }
 0x1cf   : > { %v837_v37 = vadd.f32 %v2119_v6, %v2109_v61  ;;  %841 = vadd.xlane.f32.xlu1 %v840_v11 }
 0x1d0   : > { %v803_v15 = vmul.f32 1.442695, %v753_v60  ;;  %v805_v12 = vmul.f32 1.442695, %v754_v54  ;;  %1410 = vpow2.f32 %v791_v0  ;;  %v2125_v52 = vpop.eup %1398 }
 0x1d1   : > { %1412 = vpow2.f32 %v793_v4  ;;  %v2129_v30 = vpop.eup %1400  ;;  %838 = vadd.xlane.f32.xlu0 %v837_v37 }
 0x1d2   : > { %v713_v7 = vpop.xlane.xlu0 %712  ;;  %1414 = vpow2.f32 %v803_v15  ;;  %v2133_v14 = vpop.eup %1402 }
 0x1d3   : > { %v751_v35 = vsub.f32 %v1995_v20, %v713_v7  ;;  %v752_v57 = vsub.f32 %v1999_v48, %v713_v7  ;;  %v722_v28 = vpop.xlane.xlu1 %721  ;;  %1416 = vpow2.f32 %v805_v12  ;;  %v846_v20 = vadd.f32 %v2129_v30, %v2125_v52  ;;  %v2137_v36 = vpop.eup %1404 }
 0x1d4   : > { %v757_v34 = vsub.f32 %v2007_v17, %v722_v28  ;;  %v758_v13 = vsub.f32 %v2011_v9, %v722_v28  ;;  %v843_v17 = vadd.f32 %v2137_v36, %v2133_v14 }
 0x1d5   : > { %v799_v16 = vmul.f32 1.442695, %v751_v35  ;;  %v801_v18 = vmul.f32 1.442695, %v752_v57  ;;  %847 = vadd.xlane.f32.xlu1 %v846_v20 }
 0x1d6   : > { %v811_v48 = vmul.f32 1.442695, %v757_v34  ;;  %v813_v38 = vmul.f32 1.442695, %v758_v13  ;;  %v2141_v9 = vpop.eup %1406  ;;  %844 = vadd.xlane.f32.xlu0 %v843_v17 }
 0x1d7   : > { %1418 = vpow2.f32 %v799_v16  ;;  %v719_v55 = vpop.xlane.xlu0 %718  ;;  %v2145_v39 = vpop.eup %1408 }
 0x1d8   : > { %1420 = vpow2.f32 %v801_v18  ;;  %v755_v43 = vsub.f32 %v2025_v8, %v719_v55  ;;  %v756_v40 = vsub.f32 %v2029_v31, %v719_v55  ;;  %v852_v56 = vadd.f32 %v2145_v39, %v2141_v9 }
 0x1d9   : > { %1422 = vpow2.f32 %v811_v48 }
 0x1da   : > { %1424 = vpow2.f32 %v813_v38  ;;  %v807_v44 = vmul.f32 1.442695, %v755_v43  ;;  %v809_v33 = vmul.f32 1.442695, %v756_v40  ;;  %v2149_v26 = vpop.eup %1410  ;;  %853 = vadd.xlane.f32.xlu1 %v852_v56 }
 0x1db   : > { %v728_v45 = vpop.xlane.xlu1 %727  ;;  %v2153_v31 = vpop.eup %1412 }
 0x1dc   : > { %1426 = vpow2.f32 %v807_v44  ;;  %v761_v42 = vsub.f32 %v2035_v41, %v728_v45  ;;  %v762_v8 = vsub.f32 %v2045_v47, %v728_v45  ;;  %v2157_v21 = vpop.eup %1414  ;;  %v849_v24 = vadd.f32 %v2153_v31, %v2149_v26 }
 0x1dd   : > { %v725_v10 = vpop.xlane.xlu0 %724  ;;  %1428 = vpow2.f32 %v809_v33  ;;  %v2161_v19 = vpop.eup %1416 }
 0x1de   : > { %v759_v25 = vsub.f32 %v2055_v49, %v725_v10  ;;  %v760_v1 = vsub.f32 %v2059_v53, %v725_v10  ;;  %v819_v58 = vmul.f32 1.442695, %v761_v42  ;;  %v821_v62 = vmul.f32 1.442695, %v762_v8  ;;  %850 = vadd.xlane.f32.xlu0 %v849_v24 }
 0x1df   : > { %v734_v27 = vpop.xlane.xlu1 %733  ;;  %v858_v53 = vadd.f32 %v2161_v19, %v2157_v21 }
 0x1e0   : > { %v815_v41 = vmul.f32 1.442695, %v759_v25  ;;  %v817_v47 = vmul.f32 1.442695, %v760_v1  ;;  %1430 = vpow2.f32 %v819_v58  ;;  %v765_v22 = vsub.f32 %v2049_v3, %v734_v27 }
 0x1e1   : > { %v766_v5 = vsub.f32 %v2063_v59, %v734_v27  ;;  %v731_v49 = vpop.xlane.xlu0 %730  ;;  %v2167_v60 = vpop.eup %1418  ;;  %1432 = vpow2.f32 %v821_v62  ;;  %859 = vadd.xlane.f32.xlu1 %v858_v53 }
 0x1e2   : > { %v763_v54 = vsub.f32 %v2074_v29, %v731_v49  ;;  %v764_v0 = vsub.f32 %v2077_v32, %v731_v49  ;;  %v2171_v4 = vpop.eup %1420  ;;  %1434 = vpow2.f32 %v815_v41  ;;  %v827_v15 = vmul.f32 1.442695, %v765_v22 }
 0x1e3   : > { %v829_v12 = vmul.f32 1.442695, %v766_v5  ;;  %v2173_v3 = vpop.eup %1422  ;;  %1436 = vpow2.f32 %v817_v47  ;;  %v855_v7 = vadd.f32 %v2171_v4, %v2167_v60 }
 0x1e4   : > { %v823_v59 = vmul.f32 1.442695, %v763_v54  ;;  %v825_v11 = vmul.f32 1.442695, %v764_v0  ;;  %v2177_v37 = vpop.eup %1424  ;;  %1438 = vpow2.f32 %v827_v15 }
 0x1e5   : > { %1440 = vpow2.f32 %v829_v12  ;;  %856 = vadd.xlane.f32.xlu0 %v855_v7  ;;  %v864_v29 = vadd.f32 %v2177_v37, %v2173_v3 }
 0x1e6   : > { %v2181_v32 = vpop.eup %1426  ;;  %1442 = vpow2.f32 %v823_v59 }
 0x1e7   : > { %v2183_v35 = vpop.eup %1428  ;;  %1444 = vpow2.f32 %v825_v11  ;;  %865 = vadd.xlane.f32.xlu1 %v864_v29 }
 0x1e8   : > { %v861_v57 = vadd.f32 %v2183_v35, %v2181_v32 }
 0x1ea   : > { %v2187_v28 = vpop.eup %1430  ;;  %862 = vadd.xlane.f32.xlu0 %v861_v57 }
 0x1eb   : > { %v2189_v34 = vpop.eup %1432 }
 0x1ec   : > { %v2191_v13 = vpop.eup %1434  ;;  %v870_v16 = vadd.f32 %v2189_v34, %v2187_v28 }
 0x1ed   : > { %v2195_v18 = vpop.eup %1436 }
 0x1ee   : > { %v2197_v20 = vpop.eup %1438  ;;  %871 = vadd.xlane.f32.xlu1 %v870_v16  ;;  %v867_v48 = vadd.f32 %v2195_v18, %v2191_v13 }
 0x1ef   : > { %v2201_v38 = vpop.eup %1440 }
 0x1f0   : > { %v2203_v55 = vpop.eup %1442  ;;  %868 = vadd.xlane.f32.xlu0 %v867_v48  ;;  %v876_v17 = vadd.f32 %v2201_v38, %v2197_v20 }
 0x1f1   : > { %v2207_v43 = vpop.eup %1444 }
 0x1f2   : > { %877 = vadd.xlane.f32.xlu1 %v876_v17  ;;  %v873_v40 = vadd.f32 %v2207_v43, %v2203_v55 }
 0x1f4   : > { %874 = vadd.xlane.f32.xlu0 %v873_v40 }
 0x256   : > { %v836_v44 = vpop.xlane.xlu1 %835 }
 0x257   : > { %1446 = vrcp.f32 %v836_v44  ;;  %v833_v33 = vpop.xlane.xlu0 %832 }
 0x258   : > { %1448 = vrcp.f32 %v833_v33 }
 0x25c   : > { %v842_v45 = vpop.xlane.xlu1 %841 }
 0x25e   : > { %v839_v56 = vpop.xlane.xlu0 %838 }
 0x25f   : > { %1450 = vrcp.f32 %v839_v56 }
 0x260   : > { %1452 = vrcp.f32 %v842_v45 }
 0x261   : > { %v1447_v42 = vpop.eup %1446 }
 0x262   : > { %v1449_v10 = vpop.eup %1448  ;;  %v848_v58 = vpop.xlane.xlu1 %847  ;;  %v898_v62 = vmul.f32 %v1447_v42, %v2101_v2  ;;  %v897_v41 = vmul.f32 %v1447_v42, %v2097_v51 }
 0x263   : > { %v845_v8 = vpop.xlane.xlu0 %844  ;;  %v896_v25 = vmul.f32 %v1449_v10, %v2103_v23  ;;  %v895_v1 = vmul.f32 %v1449_v10, %v2095_v46 }
 0x264   : > { %1454 = vrcp.f32 %v845_v8 }
 0x265   : > { %998 = vmatprep.mubr.f32.mxu1 %v896_v25  ;;  %1456 = vrcp.f32 %v848_v58 }
 0x266   : > { %999 = vmatmul.mubr.f32.vlgmr.msra.gmra.mrb[0].mxu1 %v895_v1 }
 0x267   : > { %1003 = vmatprep.mubr.f32.mxu1 %v898_v62  ;;  %v854_v23 = vpop.xlane.xlu1 %853 }
 0x269   : > { %v1451_v24 = vpop.eup %1450 }
 0x26a   : > { %v900_v27 = vmul.f32 %v1451_v24, %v2119_v6  ;;  %v1453_v22 = vpop.eup %1452  ;;  %1004 = vmatmul.mubr.f32.gmra.mrb[2].mxu1 %v897_v41  ;;  %v899_v46 = vmul.f32 %v1451_v24, %v2109_v61 }
 0x26b   : > { %v851_v47 = vpop.xlane.xlu0 %850  ;;  %v902_v5 = vmul.f32 %v1453_v22, %v2117_v63  ;;  %v901_v2 = vmul.f32 %v1453_v22, %v2113_v50 }
 0x26c   : > { %1008 = vmatprep.mubr.f32.mxu1 %v900_v27  ;;  %1458 = vrcp.f32 %v851_v47 }
 0x26d   : > { %1460 = vrcp.f32 %v854_v23 }
 0x26e   : > { %v1455_v49 = vpop.eup %1454  ;;  %1009 = vmatmul.mubr.f32.gmra.mrb[4].mxu1 %v899_v46  ;;  %v860_v0 = vpop.xlane.xlu1 %859 }
 0x26f   : > { %1013 = vmatprep.mubr.f32.mxu1 %v902_v5  ;;  %v904_v51 = vmul.f32 %v1455_v49, %v2137_v36  ;;  %v1457_v54 = vpop.eup %1456  ;;  %v903_v6 = vmul.f32 %v1455_v49, %v2133_v14 }
 0x270   : > { %v906_v61 = vmul.f32 %v1457_v54, %v2129_v30  ;;  %v905_v63 = vmul.f32 %v1457_v54, %v2125_v52 }
 0x272   : > { %v857_v53 = vpop.xlane.xlu0 %856  ;;  %1014 = vmatmul.mubr.f32.gmra.mrb[6].mxu1 %v901_v2 }
 0x273   : > { %1018 = vmatprep.mubr.f32.mxu1 %v904_v51  ;;  %1462 = vrcp.f32 %v857_v53 }
 0x274   : > { %1464 = vrcp.f32 %v860_v0  ;;  %v866_v11 = vpop.xlane.xlu1 %865 }
 0x276   : > { %v1459_v15 = vpop.eup %1458  ;;  %1019 = vmatmul.mubr.f32.gmra.mrb[8].mxu1 %v903_v6 }
 0x277   : > { %1023 = vmatprep.mubr.f32.mxu1 %v906_v61  ;;  %v863_v12 = vpop.xlane.xlu0 %862  ;;  %v908_v50 = vmul.f32 %v1459_v15, %v2153_v31  ;;  %v1461_v59 = vpop.eup %1460  ;;  %v907_v36 = vmul.f32 %v1459_v15, %v2149_v26 }
 0x278   : > { %1466 = vrcp.f32 %v863_v12  ;;  %v910_v14 = vmul.f32 %v1461_v59, %v2145_v39  ;;  %v909_v30 = vmul.f32 %v1461_v59, %v2141_v9 }
 0x279   : > { %1468 = vrcp.f32 %v866_v11 }
 0x27a   : > { %1024 = vmatmul.mubr.f32.gmra.mrb[10].mxu1 %v905_v63 }
 0x27b   : > { %1028 = vmatprep.mubr.f32.mxu1 %v908_v50  ;;  %v872_v16 = vpop.xlane.xlu1 %871 }
 0x27d   : > { %v1463_v7 = vpop.eup %1462  ;;  %v869_v29 = vpop.xlane.xlu0 %868 }
 0x27e   : > { %1029 = vmatmul.mubr.f32.gmra.mrb[12].mxu1 %v907_v36  ;;  %v912_v52 = vmul.f32 %v1463_v7, %v2171_v4  ;;  %v1465_v57 = vpop.eup %1464  ;;  %1470 = vrcp.f32 %v869_v29  ;;  %v911_v31 = vmul.f32 %v1463_v7, %v2167_v60 }
 0x27f   : > { %1033 = vmatprep.mubr.f32.mxu1 %v910_v14  ;;  %v914_v26 = vmul.f32 %v1465_v57, %v2161_v19  ;;  %1472 = vrcp.f32 %v872_v16  ;;  %v913_v39 = vmul.f32 %v1465_v57, %v2157_v21  ;;  %v878_v44 = vpop.xlane.xlu1 %877 }
 0x281   : > { %v875_v17 = vpop.xlane.xlu0 %874 }
 0x282   : > { %1034 = vmatmul.mubr.f32.gmra.mrb[14].mxu1 %v909_v30  ;;  %v1467_v48 = vpop.eup %1466  ;;  %1474 = vrcp.f32 %v875_v17 }
 0x283   : > { %1038 = vmatprep.mubr.f32.mxu1 %v912_v52  ;;  %v916_v9 = vmul.f32 %v1467_v48, %v2183_v35  ;;  %v1469_v40 = vpop.eup %1468  ;;  %v915_v4 = vmul.f32 %v1467_v48, %v2181_v32  ;;  %1476 = vrcp.f32 %v878_v44 }
 0x284   : > { %v918_v60 = vmul.f32 %v1469_v40, %v2177_v37  ;;  %v917_v19 = vmul.f32 %v1469_v40, %v2173_v3 }
 0x286   : > { %1039 = vmatmul.mubr.f32.gmra.mrb[16].mxu1 %v911_v31 }
 0x287   : > { %1043 = vmatprep.mubr.f32.mxu1 %v914_v26 }
 0x288   : > { %v1471_v33 = vpop.eup %1470 }
 0x289   : > { %v920_v21 = vmul.f32 %v1471_v33, %v2195_v18  ;;  %v1473_v56 = vpop.eup %1472  ;;  %v919_v35 = vmul.f32 %v1471_v33, %v2191_v13 }
 0x28a   : > { %1044 = vmatmul.mubr.f32.gmra.mrb[18].mxu1 %v913_v39  ;;  %v922_v45 = vmul.f32 %v1473_v56, %v2189_v34  ;;  %v921_v37 = vmul.f32 %v1473_v56, %v2187_v28  ;;  %v2246_v28 = vld [vmem:[%s2295_s5] ss:$0 sm:$0xff] }
 0x28b   : > { %1048 = vmatprep.mubr.f32.mxu1 %v916_v9 }
 0x28c   : > { %v1475_v42 = vpop.eup %1474 }
 0x28d   : > { %v924_v32 = vmul.f32 %v1475_v42, %v2207_v43  ;;  %v1477_v8 = vpop.eup %1476  ;;  %v923_v3 = vmul.f32 %v1475_v42, %v2203_v55 }
 0x28e   : > { %1049 = vmatmul.mubr.f32.gmra.mrb[20].mxu1 %v915_v4  ;;  %v926_v18 = vmul.f32 %v1477_v8, %v2201_v38  ;;  %v925_v13 = vmul.f32 %v1477_v8, %v2197_v20 }
 0x28f   : > { %1053 = vmatprep.mubr.f32.mxu1 %v918_v60 }
 0x292   : > { %1054 = vmatmul.mubr.f32.gmra.mrb[22].mxu1 %v917_v19 }
 0x293   : > { %1058 = vmatprep.mubr.f32.mxu1 %v920_v21 }
 0x296   : > { %1059 = vmatmul.mubr.f32.gmra.mrb[24].mxu1 %v919_v35 }
 0x297   : > { %1063 = vmatprep.mubr.f32.mxu1 %v922_v45 }
 0x29a   : > { %1064 = vmatmul.mubr.f32.gmra.mrb[26].mxu1 %v921_v37 }
 0x29b   : > { %1068 = vmatprep.mubr.f32.mxu1 %v924_v32 }
 0x29e   : > { %1069 = vmatmul.mubr.f32.gmra.mrb[28].mxu1 %v923_v3 }
 0x29f   : > { %1073 = vmatprep.mubr.f32.mxu1 %v926_v18 }
 0x2a2   : > { %1074 = vmatmul.mubr.f32.gmra.mrb[30].mxu1 %v925_v13 }
 0x339   : > { %v1262_v34 = vpop.f32.mrb[0].mxu1 }
 0x33a   : > { %v1263_v43 = vpop.f32.mrb[1].mxu1 }
 0x33b   : > { %v1264_v10 = vadd.f32 %v1263_v43, %v1262_v34 }
 0x33d   : > { %v1001_v25 = vadd.f32 %v1264_v10, %v2246_v28  ;;  %v1265_v1 = vpop.f32.mrb[2].mxu1 }
 0x33e   : > { %v1266_v20 = vpop.f32.mrb[3].mxu1 }
 0x33f   : > { %v1079_v38 = vmax.f32 %v1001_v25, 0.0  ;;  %v1267_v55 = vadd.f32 %v1266_v20, %v1265_v1 }
 0x341   : > { %1095 = vst [vmem:[%s2254_s17] sm:$0xff] %v1079_v38  ;;  %v1006_v58 = vadd.f32 %v1267_v55, %v2246_v28  ;;  %v1268_v62 = vpop.f32.mrb[4].mxu1 }
 0x342   : > { %v1269_v24 = vpop.f32.mrb[5].mxu1 }
 0x343   : > { %v1080_v41 = vmax.f32 %v1006_v58, 0.0  ;;  %v1270_v47 = vadd.f32 %v1269_v24, %v1268_v62 }
 0x345   : > { %1096 = vst [vmem:[%s2254_s17 + $0x8] sm:$0xff] %v1080_v41  ;;  %v1011_v27 = vadd.f32 %v1270_v47, %v2246_v28  ;;  %v1271_v22 = vpop.f32.mrb[6].mxu1 }
 0x346   : > { %v1272_v46 = vpop.f32.mrb[7].mxu1 }
 0x347   : > { %v1081_v23 = vmax.f32 %v1011_v27, 0.0  ;;  %v1273_v5 = vadd.f32 %v1272_v46, %v1271_v22 }
 0x349   : > { %1097 = vst [vmem:[%s2254_s17 + $0x10] sm:$0xff] %v1081_v23  ;;  %v1016_v49 = vadd.f32 %v1273_v5, %v2246_v28  ;;  %v1274_v2 = vpop.f32.mrb[8].mxu1 }
 0x34a   : > { %v1275_v53 = vpop.f32.mrb[9].mxu1 }
 0x34b   : > { %v1082_v51 = vmax.f32 %v1016_v49, 0.0  ;;  %v1276_v54 = vadd.f32 %v1275_v53, %v1274_v2 }
 0x34d   : > { %1098 = vst [vmem:[%s2254_s17 + $0x18] sm:$0xff] %v1082_v51  ;;  %v1021_v6 = vadd.f32 %v1276_v54, %v2246_v28  ;;  %v1277_v0 = vpop.f32.mrb[10].mxu1 }
 0x34e   : > { %v1278_v61 = vpop.f32.mrb[11].mxu1 }
 0x34f   : > { %v1083_v15 = vmax.f32 %v1021_v6, 0.0  ;;  %v1279_v63 = vadd.f32 %v1278_v61, %v1277_v0 }
 0x351   : > { %1099 = vst [vmem:[%s2254_s17 + $0x20] sm:$0xff] %v1083_v15  ;;  %v1026_v12 = vadd.f32 %v1279_v63, %v2246_v28  ;;  %v1280_v50 = vpop.f32.mrb[12].mxu1 }
 0x352   : > { %v1281_v59 = vpop.f32.mrb[13].mxu1 }
 0x353   : > { %v1084_v36 = vmax.f32 %v1026_v12, 0.0  ;;  %v1282_v11 = vadd.f32 %v1281_v59, %v1280_v50 }
 0x355   : > { %1100 = vst [vmem:[%s2254_s17 + $0x28] sm:$0xff] %v1084_v36  ;;  %v1031_v14 = vadd.f32 %v1282_v11, %v2246_v28  ;;  %v1283_v7 = vpop.f32.mrb[14].mxu1 }
 0x356   : > { %v1284_v30 = vpop.f32.mrb[15].mxu1 }
 0x357   : > { %v1085_v29 = vmax.f32 %v1031_v14, 0.0  ;;  %v1285_v52 = vadd.f32 %v1284_v30, %v1283_v7 }
 0x359   : > { %1101 = vst [vmem:[%s2254_s17 + $0x30] sm:$0xff] %v1085_v29  ;;  %v1036_v57 = vadd.f32 %v1285_v52, %v2246_v28  ;;  %v1286_v31 = vpop.f32.mrb[16].mxu1 }
 0x35a   : > { %v1287_v16 = vpop.f32.mrb[17].mxu1 }
 0x35b   : > { %v1086_v26 = vmax.f32 %v1036_v57, 0.0  ;;  %v1288_v48 = vadd.f32 %v1287_v16, %v1286_v31 }
 0x35d   : > { %1102 = vst [vmem:[%s2254_s17 + $0x38] sm:$0xff] %v1086_v26  ;;  %v1041_v39 = vadd.f32 %v1288_v48, %v2246_v28  ;;  %v1289_v17 = vpop.f32.mrb[18].mxu1 }
 0x35e   : > { %v1290_v9 = vpop.f32.mrb[19].mxu1 }
 0x35f   : > { %v1087_v40 = vmax.f32 %v1041_v39, 0.0  ;;  %v1291_v4 = vadd.f32 %v1290_v9, %v1289_v17 }
 0x361   : > { %1103 = vst [vmem:[%s2254_s17 + $0x40] sm:$0xff] %v1087_v40  ;;  %v1046_v44 = vadd.f32 %v1291_v4, %v2246_v28  ;;  %v1292_v60 = vpop.f32.mrb[20].mxu1 }
 0x362   : > { %v1293_v33 = vpop.f32.mrb[21].mxu1 }
 0x363   : > { %v1088_v19 = vmax.f32 %v1046_v44, 0.0  ;;  %v1294_v21 = vadd.f32 %v1293_v33, %v1292_v60 }
 0x365   : > { %1104 = vst [vmem:[%s2254_s17 + $0x48] sm:$0xff] %v1088_v19  ;;  %v1051_v56 = vadd.f32 %v1294_v21, %v2246_v28  ;;  %v1295_v35 = vpop.f32.mrb[22].mxu1 }
 0x366   : > { %v1296_v45 = vpop.f32.mrb[23].mxu1 }
 0x367   : > { %v1089_v42 = vmax.f32 %v1051_v56, 0.0  ;;  %v1297_v37 = vadd.f32 %v1296_v45, %v1295_v35 }
 0x369   : > { %1105 = vst [vmem:[%s2254_s17 + $0x50] sm:$0xff] %v1089_v42  ;;  %v1056_v32 = vadd.f32 %v1297_v37, %v2246_v28  ;;  %v1298_v8 = vpop.f32.mrb[24].mxu1 }
 0x36a   : > { %v1299_v3 = vpop.f32.mrb[25].mxu1 }
 0x36b   : > { %v1090_v18 = vmax.f32 %v1056_v32, 0.0  ;;  %v1300_v13 = vadd.f32 %v1299_v3, %v1298_v8 }
 0x36d   : > { %1106 = vst [vmem:[%s2254_s17 + $0x58] sm:$0xff] %v1090_v18  ;;  %v1061_v34 = vadd.f32 %v1300_v13, %v2246_v28  ;;  %v1301_v43 = vpop.f32.mrb[26].mxu1 }
 0x36e   : > { %v1302_v10 = vpop.f32.mrb[27].mxu1 }
 0x36f   : > { %v1091_v25 = vmax.f32 %v1061_v34, 0.0  ;;  %v1303_v1 = vadd.f32 %v1302_v10, %v1301_v43 }
 0x371   : > { %1107 = vst [vmem:[%s2254_s17 + $0x60] sm:$0xff] %v1091_v25  ;;  %v1066_v20 = vadd.f32 %v1303_v1, %v2246_v28  ;;  %v1304_v38 = vpop.f32.mrb[28].mxu1 }
 0x372   : > { %v1305_v55 = vpop.f32.mrb[29].mxu1 }
 0x373   : > { %v1092_v58 = vmax.f32 %v1066_v20, 0.0  ;;  %v1306_v62 = vadd.f32 %v1305_v55, %v1304_v38 }
 0x375   : > { %1108 = vst [vmem:[%s2254_s17 + $0x68] sm:$0xff] %v1092_v58  ;;  %v1071_v24 = vadd.f32 %v1306_v62, %v2246_v28  ;;  %v1307_v41 = vpop.f32.mrb[30].mxu1 }
 0x376   : > { %v1308_v47 = vpop.f32.mrb[31].mxu1 }
 0x377   : > { %v1093_v27 = vmax.f32 %v1071_v24, 0.0  ;;  %v1309_v22 = vadd.f32 %v1308_v47, %v1307_v41 }
 0x379   : > { %1109 = vst [vmem:[%s2254_s17 + $0x70] sm:$0xff] %v1093_v27  ;;  %v1076_v46 = vadd.f32 %v1309_v22, %v2246_v28 }
 0x37b   : > { %v1094_v23 = vmax.f32 %v1076_v46, 0.0 }
 0x37d   : > { %1110 = vst [vmem:[%s2254_s17 + $0x78] sm:$0xff] %v1094_v23 }
 0x37e PF: > { %s16_s21 = sadd.s32 1, %s1484_s21  }
 0x37f   : > { %p13_p4 = scmp.ge.s32.totalorder %s16_s21, 4  }
 0x381   :  { %15 = sbr.rel (!%p13_p4) target bundleno = 1 (0x1), region = 77 }

// kernel: gatnet_forward.11
= control target key start
LH: loop header
LB: loop body
LE: loop exit
PB: predicated region body
PF: predicated region fallthrough
CT: control target
= control target key end

     0   :  { %s1505_s21 = smov 0   ;;  %s2274_s0 = inlined_call_operand.vmem [shape: f32[256,128], index: 0, kind: input, shape index: {}, may-alias: {0,1}]   ;;  %s2275_s1 = inlined_call_operand.vmem [shape: f32[256,128], index: 1, kind: input, shape index: {}, may-alias: {0,1}]   ;;  %s2276_s2 = inlined_call_operand.vmem [shape: f32[256,256], index: 2, kind: input, shape index: {}]   ;;  %s2277_s3 = inlined_call_operand.vmem [shape: f32[1,128], index: 3, kind: input, shape index: {}]   ;;  %s2278_s4 = inlined_call_operand.vmem [shape: f32[1,128], index: 4, kind: input, shape index: {}]   ;;  %s2279_s5 = inlined_call_operand.vmem [shape: f32[1,128], index: 5, kind: input, shape index: {}]   ;;  %s2280_s6 = inlined_call_operand.vmem [shape: f32[256,128], index: 6, kind: output, shape index: {}]  }
   0x1 LB: > { %s1163_s22 = sadd.s32 4294967295, %s1468_s21   ;;  %p1167_p0 = scmp.ge.s32.totalorder %s1468_s21, 1  ;;  %s1468_s21 = sphi %s1505_s21, %s16_s21  }
   0x2   : > { %p225_p1 = scmp.lt.s32.totalorder %s1468_s21, 3 }
   0x4   : > { %p226_p2 = pnand %p1167_p0, %p225_p1 }
   0x5   : > { %v312_v0 = vld [vmem:[%s2275_s1 + $0x80] sm:$0xff] (!%p226_p2)  ;;  %v313_v1 = vld [vmem:[%s2275_s1 + $0x88] sm:$0xff] (!%p226_p2)  ;;  %s1168_s29 = sshll.u32 (!%p226_p2), %s1163_s22, 4  ;;  %v314_v5 = vld [vmem:[%s2275_s1 + $0x90] sm:$0xff] (!%p226_p2) }
   0x6   : > { %229 = sbr.rel (%p226_p2) target bundleno = 892 (0x37c), region = 44  ;;  %v296_v2 = vld [vmem:[%s2275_s1] sm:$0xff] (!%p226_p2)  ;;  %v1294_v3 = vpack.c.bf16 (!%p226_p2), %v313_v1, %v312_v0  ;;  %v297_v4 = vld [vmem:[%s2275_s1 + $0x8] sm:$0xff] (!%p226_p2)  ;;  %v315_v6 = vld [vmem:[%s2275_s1 + $0x98] sm:$0xff] (!%p226_p2)  ;;  %p262_p3 = scmp.lt.s32.totalorder (!%p226_p2), %s1168_s29, 31 }
   0x7   : > { %v1296_v7 = vpack.c.bf16 (!%p226_p2), %v297_v4, %v296_v2  ;;  %v1298_v8 = vpack.c.bf16 (!%p226_p2), %v315_v6, %v314_v5  ;;  %v298_v9 = vld [vmem:[%s2275_s1 + $0x10] sm:$0xff] (!%p226_p2)  ;;  %v299_v10 = vld [vmem:[%s2275_s1 + $0x18] sm:$0xff] (!%p226_p2)  ;;  %v316_v11 = vld [vmem:[%s2275_s1 + $0xa0] sm:$0xff] (!%p226_p2) }
   0x8   : > { %1295 = vmatprep.subr.bf16.mxu0 (!%p226_p2), %v1294_v3  ;;  %1327 = vmatprep.subr.bf16.mxu1 (!%p226_p2), %v1294_v3  ;;  %v317_v12 = vld [vmem:[%s2275_s1 + $0xa8] sm:$0xff] (!%p226_p2)  ;;  %v1300_v13 = vpack.c.bf16 (!%p226_p2), %v299_v10, %v298_v9  ;;  %v300_v15 = vld [vmem:[%s2275_s1 + $0x20] sm:$0xff] (!%p226_p2)  ;;  %v318_v17 = vld [vmem:[%s2275_s1 + $0xb0] sm:$0xff] (!%p226_p2) }
   0x9   : > { %1297 = vmatpush3.bf16.xpose.msra.mxu0 (!%p226_p2), %v1296_v7  ;;  %1329 = vmatpush3.bf16.msra.mxu1 (!%p226_p2), %v1296_v7  ;;  %v1302_v14 = vpack.c.bf16 (!%p226_p2), %v317_v12, %v316_v11  ;;  %v301_v16 = vld [vmem:[%s2275_s1 + $0x28] sm:$0xff] (!%p226_p2)  ;;  %v319_v18 = vld [vmem:[%s2275_s1 + $0xb8] sm:$0xff] (!%p226_p2)  ;;  %v302_v19 = vld [vmem:[%s2275_s1 + $0x30] sm:$0xff] (!%p226_p2) }
   0xa   : > { %1299 = vmatprep.subr.bf16.mxu0 (!%p226_p2), %v1298_v8  ;;  %1331 = vmatprep.subr.bf16.mxu1 (!%p226_p2), %v1298_v8  ;;  %v1304_v20 = vpack.c.bf16 (!%p226_p2), %v301_v16, %v300_v15  ;;  %v303_v21 = vld [vmem:[%s2275_s1 + $0x38] sm:$0xff] (!%p226_p2)  ;;  %v320_v22 = vld [vmem:[%s2275_s1 + $0xc0] sm:$0xff] (!%p226_p2)  ;;  %v1306_v24 = vpack.c.bf16 (!%p226_p2), %v319_v18, %v318_v17  ;;  %v321_v28 = vld [vmem:[%s2275_s1 + $0xc8] sm:$0xff] (!%p226_p2) }
   0xb   : > { %v1577_v23 = vld [vmem:[%s2277_s3] sm:$0x1] (!%p226_p2)  ;;  %v1308_v33 = vpack.c.bf16 (!%p226_p2), %v303_v21, %v302_v19  ;;  %v1310_v37 = vpack.c.bf16 (!%p226_p2), %v321_v28, %v320_v22  ;;  %v305_v38 = vld [vmem:[%s2275_s1 + $0x48] sm:$0xff] (!%p226_p2)  ;;  %v322_v41 = vld [vmem:[%s2275_s1 + $0xd0] sm:$0xff] (!%p226_p2) }
   0xc   : > { %1212 = vmatprep.mubr.f32.mxu0 (!%p226_p2), %v1577_v23  ;;  %v1584_v26 = vld [vmem:[%s2278_s4] ss:$0 sm:$0xff] (!%p226_p2)  ;;  %v323_v42 = vld [vmem:[%s2275_s1 + $0xd8] sm:$0xff] (!%p226_p2)  ;;  %v306_v44 = vld [vmem:[%s2275_s1 + $0x50] sm:$0xff] (!%p226_p2) }
   0xd   : > { %s2282_s29 = smov (!%p262_p3, %s1168_s29), 31  ;;  %1333 = vmatpush3.bf16.msra.mxu1 %v1300_v13  ;;  %v304_v34 = vld [vmem:[%s2275_s1 + $0x40] sm:$0xff]  ;;  %v1314_v47 = vpack.c.bf16 %v323_v42, %v322_v41  ;;  %v307_v48 = vld [vmem:[%s2275_s1 + $0x58] sm:$0xff]  ;;  %v325_v52 = vld [vmem:[%s2275_s1 + $0xe8] sm:$0xff] }
   0xe   : > { %s1169_s20 = sshll.u32 %s2282_s29, 3  ;;  %1335 = vmatprep.subr.bf16.mxu1 %v1302_v14  ;;  %v1312_v43 = vpack.c.bf16 %v305_v38, %v304_v34  ;;  %v324_v51 = vld [vmem:[%s2275_s1 + $0xe0] sm:$0xff]  ;;  %v1316_v53 = vpack.c.bf16 %v307_v48, %v306_v44  ;;  %v309_v58 = vld [vmem:[%s2275_s1 + $0x68] sm:$0xff]  ;;  %v326_v61 = vld [vmem:[%s2275_s1 + $0xf0] sm:$0xff] }
   0xf   : > { %s1563_s9 = scalar_lea.vmem %s2274_s0, %s1169_s20  ;;  %v308_v54 = vld [vmem:[%s2275_s1 + $0x60] sm:$0xff]  ;;  %v1318_v57 = vpack.c.bf16 %v325_v52, %v324_v51  ;;  %v327_v62 = vld [vmem:[%s2275_s1 + $0xf8] sm:$0xff]  ;;  %v310_v0 = vld [vmem:[%s2275_s1 + $0x70] sm:$0xff]  ;;  %s2237_s17 = scalar_lea.vmem %s2280_s6, %s1169_s20 }
  0x10   : > { %v282_v25 = vld [vmem:[%s1563_s9 + $0x10] sm:$0xff]  ;;  %v280_v27 = vld [vmem:[%s1563_s9] sm:$0xff]  ;;  %v283_v31 = vld [vmem:[%s1563_s9 + $0x18] sm:$0xff]  ;;  %v1320_v63 = vpack.c.bf16 %v309_v58, %v308_v54  ;;  %v1322_v3 = vpack.c.bf16 %v327_v62, %v326_v61 }
  0x11   : > { %1301 = vmatpush3.bf16.xpose.msra.mxu0 %v1300_v13  ;;  %v337_v29 = vmul.f32 %v1584_v26, %v282_v25  ;;  %v335_v30 = vmul.f32 %v1584_v26, %v280_v27  ;;  %v281_v32 = vld [vmem:[%s1563_s9 + $0x8] sm:$0xff]  ;;  %1337 = vmatpush3.bf16.msra.mxu1 %v1304_v20  ;;  %v338_v35 = vmul.f32 %v1584_v26, %v283_v31  ;;  %v284_v40 = vld [vmem:[%s1563_s9 + $0x20] sm:$0xff]  ;;  %v287_v49 = vld [vmem:[%s1563_s9 + $0x38] sm:$0xff] }
  0x12   : > { %1303 = vmatprep.subr.bf16.mxu0 %v1302_v14  ;;  %1339 = vmatprep.subr.bf16.mxu1 %v1306_v24  ;;  %v336_v36 = vmul.f32 %v1584_v26, %v281_v32  ;;  %v285_v39 = vld [vmem:[%s1563_s9 + $0x28] sm:$0xff]  ;;  %v339_v46 = vmul.f32 %v1584_v26, %v284_v40  ;;  %v286_v50 = vld [vmem:[%s1563_s9 + $0x30] sm:$0xff]  ;;  %v342_v55 = vmul.f32 %v1584_v26, %v287_v49  ;;  %v288_v60 = vld [vmem:[%s1563_s9 + $0x40] sm:$0xff] }
  0x13   : > { %355 = vadd.xlane.f32.xlu1 %v337_v29  ;;  %351 = vadd.xlane.f32.xlu0 %v335_v30  ;;  %v340_v45 = vmul.f32 %v1584_v26, %v285_v39  ;;  %v341_v56 = vmul.f32 %v1584_v26, %v286_v50  ;;  %v289_v59 = vld [vmem:[%s1563_s9 + $0x48] sm:$0xff]  ;;  %v343_v2 = vmul.f32 %v1584_v26, %v288_v60  ;;  %v311_v4 = vld [vmem:[%s2275_s1 + $0x78] sm:$0xff]  ;;  %v290_v6 = vld [vmem:[%s1563_s9 + $0x50] sm:$0xff]  ;;  %v455_v30 = vlaneseq }
  0x14   : > { %v344_v1 = vmul.f32 %v1584_v26, %v289_v59  ;;  %v291_v5 = vld [vmem:[%s1563_s9 + $0x58] sm:$0xff]  ;;  %v1324_v7 = vpack.c.bf16 %v311_v4, %v310_v0  ;;  %v345_v9 = vmul.f32 %v1584_v26, %v290_v6  ;;  %v293_v10 = vld [vmem:[%s1563_s9 + $0x68] sm:$0xff]  ;;  %v292_v11 = vld [vmem:[%s1563_s9 + $0x60] sm:$0xff] }
  0x15   : > { %1341 = vmatpush3.bf16.msra.mxu1 %v1308_v33  ;;  %v346_v8 = vmul.f32 %v1584_v26, %v291_v5  ;;  %v348_v12 = vmul.f32 %v1584_v26, %v293_v10  ;;  %v347_v13 = vmul.f32 %v1584_v26, %v292_v11  ;;  %v295_v14 = vld [vmem:[%s1563_s9 + $0x78] sm:$0xff]  ;;  %v294_v15 = vld [vmem:[%s1563_s9 + $0x70] sm:$0xff]  ;;  %s1179_s9 = sshll.u32 %s2282_s29, 4  ;;  %v456_v32 = vshrl.u32 %v455_v30, 7 }
  0x16   : > { %1343 = vmatprep.subr.bf16.mxu1 %v1310_v37  ;;  %v350_v16 = vmul.f32 %v1584_v26, %v295_v14  ;;  %v349_v17 = vmul.f32 %v1584_v26, %v294_v15  ;;  %s1691_s12 = scalar_lea.vmem %s2276_s2, %s1179_s9 }
  0x17   : > { %357 = vadd.xlane.f32.xlu1 %v338_v35  ;;  %353 = vadd.xlane.f32.xlu0 %v336_v36  ;;  %v457_v34 = vsub.s32 0, %v456_v32  ;;  %v591_v35 = vld [vmem:[%s1691_s12] sm:$0xff]  ;;  %v593_v38 = vld [vmem:[%s1691_s12 + $0x10] sm:$0xff]  ;;  %v594_v39 = vld [vmem:[%s1691_s12 + $0x18] sm:$0xff] }
  0x18   : > { %v1698_v42 = vld [vmem:[%s1691_s12 + $0x20] sm:$0xff]  ;;  %vm623_vm0 = vcmp.gt.f32.partialorder %v591_v35, 0.5  ;;  %vm625_vm2 = vcmp.gt.f32.partialorder %v593_v38, 0.5  ;;  %vm626_vm3 = vcmp.gt.f32.partialorder %v594_v39, 0.5  ;;  %v1711_v48 = vld [vmem:[%s1691_s12 + $0x38] sm:$0xff] }
  0x19   : > { %1305 = vmatpush3.bf16.xpose.msra.mxu0 %v1304_v20  ;;  %1345 = vmatpush3.bf16.msra.mxu1 %v1312_v43  ;;  %vm627_vm4 = vcmp.gt.f32.partialorder %v1698_v42, 0.5  ;;  %v1735_v58 = vld [vmem:[%s1691_s12 + $0x58] sm:$0xff]  ;;  %vm630_vm9 = vcmp.gt.f32.partialorder %v1711_v48, 0.5  ;;  %v1746_v61 = vld [vmem:[%s1691_s12 + $0x40] sm:$0xff] }
  0x1a   : > { %1307 = vmatprep.subr.bf16.mxu0 %v1306_v24  ;;  %1347 = vmatprep.subr.bf16.mxu1 %v1314_v47  ;;  %vm634_vm14 = vcmp.gt.f32.partialorder %v1735_v58, 0.5  ;;  %vm631_vm15 = vcmp.gt.f32.partialorder %v1746_v61, 0.5 }
  0x1b   : > { %361 = vadd.xlane.f32.xlu1 %v340_v45  ;;  %359 = vadd.xlane.f32.xlu0 %v339_v46  ;;  %v1703_v45 = vld [vmem:[%s1691_s12 + $0x28] sm:$0xff] }
  0x1c   : > { %vm628_vm5 = vcmp.gt.f32.partialorder %v1703_v45, 0.5 }
  0x1d   : > { %1349 = vmatpush3.bf16.msra.mxu1 %v1316_v53 }
  0x1e   : > { %1351 = vmatprep.subr.bf16.mxu1 %v1318_v57 }
  0x1f   : > { %365 = vadd.xlane.f32.xlu1 %v342_v55  ;;  %363 = vadd.xlane.f32.xlu0 %v341_v56 }
  0x21   : > { %1309 = vmatpush3.bf16.xpose.msra.mxu0 %v1308_v33  ;;  %1353 = vmatpush3.bf16.msra.mxu1 %v1320_v63 }
  0x22   : > { %1311 = vmatprep.subr.bf16.mxu0 %v1310_v37  ;;  %1355 = vmatprep.subr.bf16.mxu1 %v1322_v3  ;;  %v592_v37 = vld [vmem:[%s1691_s12 + $0x8] sm:$0xff] }
  0x23   : > { %369 = vadd.xlane.f32.xlu1 %v344_v1  ;;  %367 = vadd.xlane.f32.xlu0 %v343_v2  ;;  %vm624_vm1 = vcmp.gt.f32.partialorder %v592_v37, 0.5  ;;  %v1798_v37 = vld [vmem:[%s1691_s12 + $0x60] sm:$0xff] }
  0x25   : > { %1357 = vmatpush3.bf16.msra.mxu1 %v1324_v7 }
  0x27   : > { %373 = vadd.xlane.f32.xlu1 %v346_v8  ;;  %371 = vadd.xlane.f32.xlu0 %v345_v9  ;;  %v1763_v8 = vld [vmem:[%s1691_s12 + $0x48] sm:$0xff] }
  0x29   : > { %1313 = vmatpush3.bf16.xpose.msra.mxu0 %v1312_v43 }
  0x2a   : > { %1315 = vmatprep.subr.bf16.mxu0 %v1314_v47  ;;  %v1708_v47 = vld [vmem:[%s1691_s12 + $0x30] sm:$0xff] }
  0x2b   : > { %377 = vadd.xlane.f32.xlu1 %v348_v12  ;;  %375 = vadd.xlane.f32.xlu0 %v347_v13  ;;  %vm629_vm8 = vcmp.gt.f32.partialorder %v1708_v47, 0.5  ;;  %v1770_v12 = vld [vmem:[%s1691_s12 + $0x70] sm:$0xff] }
  0x2f   : > { %381 = vadd.xlane.f32.xlu1 %v350_v16  ;;  %379 = vadd.xlane.f32.xlu0 %v349_v17 }
  0x31   : > { %1317 = vmatpush3.bf16.xpose.msra.mxu0 %v1316_v53 }
  0x32   : > { %1319 = vmatprep.subr.bf16.mxu0 %v1318_v57  ;;  %v1732_v57 = vld [vmem:[%s1691_s12 + $0x50] sm:$0xff] }
  0x33   : > { %vm633_vm13 = vcmp.gt.f32.partialorder %v1732_v57, 0.5  ;;  %v1869_v57 = vld [vmem:[%s1691_s12 + $0xb0] sm:$0xff] }
  0x39   : > { %1321 = vmatpush3.bf16.xpose.msra.mxu0 %v1320_v63 }
  0x3a   : > { %1323 = vmatprep.subr.bf16.mxu0 %v1322_v3 }
  0x41   : > { %1325 = vmatpush3.bf16.xpose.msra.mxu0 %v1324_v7 }
  0x48   : > { %1213 = vmatmul.mubr.f32.vlgmr.msra.gmra.mrb[0].mxu0 %v1577_v23 }
  0xa0   : > { %v1663_v18 = vpop.xlane.xlu1 %355  ;;  %v352_v19 = vpop.xlane.xlu0 %351 }
  0xa4   : > { %v1665_v20 = vpop.xlane.xlu1 %357  ;;  %v354_v21 = vpop.xlane.xlu0 %353 }
  0xa8   : > { %v1667_v22 = vpop.xlane.xlu1 %361  ;;  %v1669_v24 = vpop.xlane.xlu0 %359 }
  0xac   : > { %v1671_v25 = vpop.xlane.xlu1 %365  ;;  %v1673_v26 = vpop.xlane.xlu0 %363 }
  0xb0   : > { %v1675_v27 = vpop.xlane.xlu1 %369  ;;  %v1677_v28 = vpop.xlane.xlu0 %367 }
  0xb4   : > { %v1679_v29 = vpop.xlane.xlu1 %373  ;;  %v1681_v23 = vpop.xlane.xlu0 %371 }
  0xb8   : > { %v1684_v31 = vpop.xlane.xlu1 %377  ;;  %v1686_v33 = vpop.xlane.xlu0 %375 }
  0xbc   : > { %v382_v36 = vpop.xlane.xlu1 %381  ;;  %v380_v41 = vpop.xlane.xlu0 %379 }
 0x11b   : > { %v450_v40 = vpop.f32.mrb[0].mxu0 }
 0x11c   : > { %v1700_v43 = vrot.slane %v450_v40, %v457_v34  ;;  %v452_v44 = vpop.f32.mrb[1].mxu0 }
 0x11d   : > { %v1705_v46 = vrot.slane %v452_v44, %v457_v34 }
 0x11e   : > { %v1714_v49 = vadd.f32 %v1700_v43, %v382_v36  ;;  %v1717_v50 = vadd.f32 %v1700_v43, %v380_v41  ;;  %v463_v51 = vadd.f32 %v1700_v43, %v352_v19  ;;  %v465_v52 = vadd.f32 %v1700_v43, %v354_v21 }
 0x11f   : > { %v1723_v53 = vadd.f32 %v1705_v46, %v382_v36  ;;  %v1726_v54 = vadd.f32 %v1705_v46, %v380_v41  ;;  %v464_v55 = vadd.f32 %v1705_v46, %v352_v19  ;;  %v466_v56 = vadd.f32 %v1705_v46, %v354_v21 }
 0x120   : > { %v1738_v59 = vmul.f32 0.2, %v1714_v49  ;;  %v1741_v60 = vmul.f32 0.2, %v1717_v50  ;;  %vm495_vm6 = vcmp.gt.f32.partialorder %v463_v51, 0.0  ;;  %vm497_vm7 = vcmp.gt.f32.partialorder %v465_v52, 0.0 }
 0x121   : > { %v1749_v62 = vmul.f32 0.2, %v1723_v53  ;;  %v1752_v63 = vmul.f32 0.2, %v1726_v54  ;;  %vm496_vm10 = vcmp.gt.f32.partialorder %v464_v55, 0.0  ;;  %vm498_vm11 = vcmp.gt.f32.partialorder %v466_v56, 0.0 }
 0x122   : > { %v527_v0 = vmul.f32 0.2, %v463_v51  ;;  %v528_v1 = vmul.f32 0.2, %v464_v55  ;;  %v529_v2 = vmul.f32 0.2, %v465_v52  ;;  %v467_v3 = vadd.f32 %v1700_v43, %v1663_v18 }
 0x123   : > { %v530_v4 = vmul.f32 0.2, %v466_v56  ;;  %v468_v5 = vadd.f32 %v1705_v46, %v1663_v18  ;;  %v469_v6 = vadd.f32 %v1700_v43, %v1665_v20  ;;  %v470_v7 = vadd.f32 %v1705_v46, %v1665_v20  ;;  %v1790_v20 = vld [vmem:[%s1691_s12 + $0x78] sm:$0xff] }
 0x124   : > { %v559_v9 = vsel %vm495_vm6, %v463_v51, %v527_v0  ;;  %v560_v10 = vsel %vm496_vm10, %v464_v55, %v528_v1  ;;  %v561_v11 = vsel %vm497_vm7, %v465_v52, %v529_v2  ;;  %vm499_vm12 = vcmp.gt.f32.partialorder %v467_v3, 0.0  ;;  %v1817_v52 = vld [vmem:[%s1691_s12 + $0x68] sm:$0xff]  ;;  %v1820_v55 = vld [vmem:[%s1691_s12 + $0x90] sm:$0xff]  ;;  %v1834_v0 = vld [vmem:[%s1691_s12 + $0x98] sm:$0xff] }
 0x125   : > { %v1773_v13 = vsel %vm623_vm0, %v559_v9, -1e+30  ;;  %v1776_v14 = vsel %vm624_vm1, %v560_v10, -1e+30  ;;  %v562_v15 = vsel %vm498_vm11, %v466_v56, %v530_v4  ;;  %v1780_v16 = vsel %vm625_vm2, %v561_v11, -1e+30 }
 0x126   : > { %v687_v17 = vmax.f32 %v1773_v13, %v1776_v14  ;;  %v1786_v18 = vsel %vm626_vm3, %v562_v15, -1e+30  ;;  %vm500_vm6 = vcmp.gt.f32.partialorder %v468_v5, 0.0  ;;  %v531_v19 = vmul.f32 0.2, %v467_v3  ;;  %v1849_v9 = vld [vmem:[%s1691_s12 + $0x80] sm:$0xff] }
 0x127   : > { %vm632_vm0 = vcmp.gt.f32.partialorder %v1763_v8, 0.5  ;;  %v690_v21 = vmax.f32 %v1780_v16, %v1786_v18  ;;  %v532_v30 = vmul.f32 0.2, %v468_v5  ;;  %vm501_vm1 = vcmp.gt.f32.partialorder %v469_v6, 0.0  ;;  %v1860_v15 = vld [vmem:[%s1691_s12 + $0x88] sm:$0xff] }
 0x128   : > { %vm502_vm2 = vcmp.gt.f32.partialorder %v470_v7, 0.0  ;;  %688 = vmax.xlane.f32.xlu0 %v687_v17  ;;  %v563_v32 = vsel %vm499_vm12, %v467_v3, %v531_v19  ;;  %v533_v34 = vmul.f32 0.2, %v469_v6  ;;  %v534_v35 = vmul.f32 0.2, %v470_v7 }
 0x129   : > { %v473_v36 = vadd.f32 %v1700_v43, %v1667_v22  ;;  %691 = vmax.xlane.f32.xlu1 %v690_v21  ;;  %v564_v38 = vsel %vm500_vm6, %v468_v5, %v532_v30  ;;  %v1802_v39 = vsel %vm627_vm4, %v563_v32, -1e+30  ;;  %v474_v40 = vadd.f32 %v1705_v46, %v1667_v22  ;;  %v1872_v30 = vld [vmem:[%s1691_s12 + $0xb8] sm:$0xff] }
 0x12a   : > { %v471_v41 = vadd.f32 %v1700_v43, %v1669_v24  ;;  %vm637_vm3 = vcmp.gt.f32.partialorder %v1770_v12, 0.5  ;;  %vm638_vm7 = vcmp.gt.f32.partialorder %v1790_v20, 0.5  ;;  %v1812_v44 = vsel %vm628_vm5, %v564_v38, -1e+30 }
 0x12b   : > { %v565_v51 = vsel %vm501_vm1, %v469_v6, %v533_v34  ;;  %v566_v42 = vsel %vm502_vm2, %v470_v7, %v534_v35  ;;  %vm505_vm4 = vcmp.gt.f32.partialorder %v473_v36, 0.0  ;;  %v693_v22 = vmax.f32 %v1802_v39, %v1812_v44 }
 0x12c   : > { %v1826_v56 = vsel %vm629_vm8, %v565_v51, -1e+30  ;;  %v1830_v45 = vsel %vm630_vm9, %v566_v42, -1e+30  ;;  %vm506_vm5 = vcmp.gt.f32.partialorder %v474_v40, 0.0  ;;  %vm635_vm10 = vcmp.gt.f32.partialorder %v1798_v37, 0.5 }
 0x12d   : > { %v696_v1 = vmax.f32 %v1826_v56, %v1830_v45  ;;  %v537_v2 = vmul.f32 0.2, %v473_v36  ;;  %v538_v3 = vmul.f32 0.2, %v474_v40  ;;  %v472_v47 = vadd.f32 %v1705_v46, %v1669_v24  ;;  %694 = vmax.xlane.f32.xlu0 %v693_v22  ;;  %v1897_v42 = vld [vmem:[%s1691_s12 + $0xa8] sm:$0xff] }
 0x12e   : > { %vm503_vm8 = vcmp.gt.f32.partialorder %v471_v41, 0.0  ;;  %v535_v4 = vmul.f32 0.2, %v471_v41  ;;  %v477_v48 = vadd.f32 %v1700_v43, %v1671_v25  ;;  %v478_v5 = vadd.f32 %v1705_v46, %v1671_v25 }
 0x12f   : > { %vm636_vm9 = vcmp.gt.f32.partialorder %v1817_v52, 0.5  ;;  %697 = vmax.xlane.f32.xlu1 %v696_v1  ;;  %v569_v6 = vsel %vm505_vm4, %v473_v36, %v537_v2  ;;  %v570_v7 = vsel %vm506_vm5, %v474_v40, %v538_v3  ;;  %vm504_vm11 = vcmp.gt.f32.partialorder %v472_v47, 0.0 }
 0x130   : > { %v536_v24 = vmul.f32 0.2, %v472_v47  ;;  %vm641_vm12 = vcmp.gt.f32.partialorder %v1820_v55, 0.5  ;;  %vm642_vm6 = vcmp.gt.f32.partialorder %v1834_v0, 0.5  ;;  %v1853_v10 = vsel %vm633_vm13, %v569_v6, -1e+30 }
 0x131   : > { %v1857_v25 = vsel %vm634_vm14, %v570_v7, -1e+30  ;;  %v567_v11 = vsel %vm503_vm8, %v471_v41, %v535_v4  ;;  %vm509_vm1 = vcmp.gt.f32.partialorder %v477_v48, 0.0  ;;  %vm510_vm2 = vcmp.gt.f32.partialorder %v478_v5, 0.0  ;;  %v1965_v0 = vld [vmem:[%s1691_s12 + $0xe0] sm:$0xff] }
 0x132   : > { %v702_v17 = vmax.f32 %v1853_v10, %v1857_v25  ;;  %v568_v19 = vsel %vm504_vm11, %v472_v47, %v536_v24  ;;  %v1866_v21 = vsel %vm631_vm15, %v567_v11, -1e+30  ;;  %v541_v32 = vmul.f32 0.2, %v477_v48  ;;  %v1910_v47 = vld [vmem:[%s1691_s12 + $0xd0] sm:$0xff]  ;;  %v1927_v24 = vld [vmem:[%s1691_s12 + $0xd8] sm:$0xff] }
 0x133   : > { %v1876_v58 = vsel %vm632_vm0, %v568_v19, -1e+30  ;;  %v542_v34 = vmul.f32 0.2, %v478_v5  ;;  %v475_v35 = vadd.f32 %v1700_v43, %v1673_v26  ;;  %v476_v36 = vadd.f32 %v1705_v46, %v1673_v26  ;;  %v1894_v26 = vld [vmem:[%s1691_s12 + $0xa0] sm:$0xff] }
 0x134   : > { %703 = vmax.xlane.f32.xlu1 %v702_v17  ;;  %v699_v61 = vmax.f32 %v1866_v21, %v1876_v58  ;;  %v481_v38 = vadd.f32 %v1700_v43, %v1675_v27  ;;  %v482_v8 = vadd.f32 %v1705_v46, %v1675_v27  ;;  %vm639_vm13 = vcmp.gt.f32.partialorder %v1849_v9, 0.5  ;;  %v1937_v19 = vld [vmem:[%s1691_s12 + $0xc0] sm:$0xff] }
 0x135   : > { %vm640_vm14 = vcmp.gt.f32.partialorder %v1860_v15, 0.5  ;;  %v573_v40 = vsel %vm509_vm1, %v477_v48, %v541_v32  ;;  %v574_v41 = vsel %vm510_vm2, %v478_v5, %v542_v34  ;;  %vm507_vm15 = vcmp.gt.f32.partialorder %v475_v35, 0.0  ;;  %v1943_v32 = vld [vmem:[%s1691_s12 + $0xf0] sm:$0xff] }
 0x136   : > { %v539_v51 = vmul.f32 0.2, %v475_v35  ;;  %vm645_vm0 = vcmp.gt.f32.partialorder %v1869_v57, 0.5  ;;  %vm646_vm4 = vcmp.gt.f32.partialorder %v1872_v30, 0.5  ;;  %700 = vmax.xlane.f32.xlu0 %v699_v61  ;;  %v1901_v27 = vsel %vm637_vm3, %v573_v40, -1e+30 }
 0x137   : > { %v1905_v22 = vsel %vm638_vm7, %v574_v41, -1e+30  ;;  %vm508_vm5 = vcmp.gt.f32.partialorder %v476_v36, 0.0  ;;  %vm513_vm8 = vcmp.gt.f32.partialorder %v481_v38, 0.0  ;;  %v540_v2 = vmul.f32 0.2, %v476_v36 }
 0x138   : > { %v708_v1 = vmax.f32 %v1901_v27, %v1905_v22  ;;  %v571_v3 = vsel %vm507_vm15, %v475_v35, %v539_v51  ;;  %vm514_vm11 = vcmp.gt.f32.partialorder %v482_v8, 0.0  ;;  %v545_v4 = vmul.f32 0.2, %v481_v38  ;;  %v1956_v61 = vld [vmem:[%s1691_s12 + $0xf8] sm:$0xff] }
 0x139   : > { %v1914_v12 = vsel %vm635_vm10, %v571_v3, -1e+30  ;;  %v546_v20 = vmul.f32 0.2, %v482_v8  ;;  %v479_v48 = vadd.f32 %v1700_v43, %v1677_v28  ;;  %v572_v5 = vsel %vm508_vm5, %v476_v36, %v540_v2 }
 0x13a   : > { %709 = vmax.xlane.f32.xlu1 %v708_v1  ;;  %v480_v6 = vadd.f32 %v1705_v46, %v1677_v28  ;;  %v485_v7 = vadd.f32 %v1700_v43, %v1679_v29  ;;  %v486_v37 = vadd.f32 %v1705_v46, %v1679_v29  ;;  %vm643_vm3 = vcmp.gt.f32.partialorder %v1894_v26, 0.5  ;;  %v1940_v29 = vld [vmem:[%s1691_s12 + $0xc8] sm:$0xff] }
 0x13b   : > { %vm644_vm7 = vcmp.gt.f32.partialorder %v1897_v42, 0.5  ;;  %v1931_v11 = vsel %vm636_vm9, %v572_v5, -1e+30  ;;  %v577_v17 = vsel %vm513_vm8, %v481_v38, %v545_v4  ;;  %v578_v28 = vsel %vm514_vm11, %v482_v8, %v546_v20  ;;  %v620_v4 = vld [vmem:[%s1691_s12 + $0xe8] sm:$0xff] }
 0x13c   : > { %vm511_vm10 = vcmp.gt.f32.partialorder %v479_v48, 0.0  ;;  %vm649_vm1 = vcmp.gt.f32.partialorder %v1910_v47, 0.5  ;;  %v705_v34 = vmax.f32 %v1914_v12, %v1931_v11  ;;  %v1949_v52 = vsel %vm641_vm12, %v577_v17, -1e+30 }
 0x13d   : > { %v1953_v35 = vsel %vm642_vm6, %v578_v28, -1e+30  ;;  %vm512_vm9 = vcmp.gt.f32.partialorder %v480_v6, 0.0  ;;  %v543_v38 = vmul.f32 0.2, %v479_v48  ;;  %vm517_vm2 = vcmp.gt.f32.partialorder %v485_v7, 0.0 }
 0x13e   : > { %v714_v36 = vmax.f32 %v1949_v52, %v1953_v35  ;;  %v544_v8 = vmul.f32 0.2, %v480_v6  ;;  %706 = vmax.xlane.f32.xlu0 %v705_v34  ;;  %vm518_vm15 = vcmp.gt.f32.partialorder %v486_v37, 0.0  ;;  %v549_v55 = vmul.f32 0.2, %v485_v7 }
 0x13f   : > { %v550_v40 = vmul.f32 0.2, %v486_v37  ;;  %v483_v41 = vadd.f32 %v1700_v43, %v1681_v23  ;;  %vm650_vm12 = vcmp.gt.f32.partialorder %v1927_v24, 0.5  ;;  %vm653_vm6 = vcmp.gt.f32.partialorder %v1943_v32, 0.5 }
 0x140   : > { %715 = vmax.xlane.f32.xlu1 %v714_v36  ;;  %v575_v51 = vsel %vm511_vm10, %v479_v48, %v543_v38  ;;  %v576_v1 = vsel %vm512_vm9, %v480_v6, %v544_v8  ;;  %v484_v2 = vadd.f32 %v1705_v46, %v1681_v23  ;;  %v489_v3 = vadd.f32 %v1700_v43, %v1684_v31 }
 0x141   : > { %vm647_vm5 = vcmp.gt.f32.partialorder %v1937_v19, 0.5  ;;  %vm648_vm8 = vcmp.gt.f32.partialorder %v1940_v29, 0.5  ;;  %vm654_vm11 = vcmp.gt.f32.partialorder %v1956_v61, 0.5  ;;  %v1979_v20 = vsel %vm639_vm13, %v575_v51, -1e+30 }
 0x142   : > { %v1983_v48 = vsel %vm640_vm14, %v576_v1, -1e+30  ;;  %v581_v23 = vsel %vm517_vm2, %v485_v7, %v549_v55  ;;  %v582_v5 = vsel %vm518_vm15, %v486_v37, %v550_v40  ;;  %vm515_vm13 = vcmp.gt.f32.partialorder %v483_v41, 0.0 }
 0x143   : > { %v711_v6 = vmax.f32 %v1979_v20, %v1983_v48  ;;  %v1991_v17 = vsel %vm645_vm0, %v581_v23, -1e+30  ;;  %v1995_v9 = vsel %vm646_vm4, %v582_v5, -1e+30  ;;  %vm651_vm10 = vcmp.gt.f32.partialorder %v1965_v0, 0.5 }
 0x144   : > { %v720_v15 = vmax.f32 %v1991_v17, %v1995_v9  ;;  %vm516_vm14 = vcmp.gt.f32.partialorder %v484_v2, 0.0  ;;  %v547_v7 = vmul.f32 0.2, %v483_v41  ;;  %v548_v37 = vmul.f32 0.2, %v484_v2 }
 0x145   : > { %vm652_vm9 = vcmp.gt.f32.partialorder %v620_v4, 0.5  ;;  %712 = vmax.xlane.f32.xlu0 %v711_v6  ;;  %v490_v57 = vadd.f32 %v1705_v46, %v1684_v31  ;;  %vm521_vm0 = vcmp.gt.f32.partialorder %v489_v3, 0.0  ;;  %v553_v28 = vmul.f32 0.2, %v489_v3 }
 0x146   : > { %v487_v30 = vadd.f32 %v1700_v43, %v1686_v33  ;;  %721 = vmax.xlane.f32.xlu1 %v720_v15  ;;  %v579_v34 = vsel %vm515_vm13, %v483_v41, %v547_v7  ;;  %v580_v36 = vsel %vm516_vm14, %v484_v2, %v548_v37  ;;  %v488_v38 = vadd.f32 %v1705_v46, %v1686_v33 }
 0x147   : > { %vm525_vm4 = vcmp.gt.f32.partialorder %v1714_v49, 0.0  ;;  %v2009_v8 = vsel %vm643_vm3, %v579_v34, -1e+30  ;;  %v2013_v31 = vsel %vm644_vm7, %v580_v36, -1e+30  ;;  %vm522_vm2 = vcmp.gt.f32.partialorder %v490_v57, 0.0 }
 0x148   : > { %v585_v55 = vsel %vm521_vm0, %v489_v3, %v553_v28  ;;  %v717_v43 = vmax.f32 %v2009_v8, %v2013_v31  ;;  %v554_v40 = vmul.f32 0.2, %v490_v57  ;;  %vm519_vm15 = vcmp.gt.f32.partialorder %v487_v30, 0.0 }
 0x149   : > { %v2019_v41 = vsel %vm649_vm1, %v585_v55, -1e+30  ;;  %vm520_vm13 = vcmp.gt.f32.partialorder %v488_v38, 0.0  ;;  %v551_v33 = vmul.f32 0.2, %v487_v30  ;;  %vm526_vm3 = vcmp.gt.f32.partialorder %v1723_v53, 0.0 }
 0x14a   : > { %v552_v46 = vmul.f32 0.2, %v488_v38  ;;  %718 = vmax.xlane.f32.xlu0 %v717_v43  ;;  %v586_v26 = vsel %vm522_vm2, %v490_v57, %v554_v40  ;;  %v589_v42 = vsel %vm525_vm4, %v1714_v49, %v1738_v59  ;;  %v590_v51 = vsel %vm526_vm3, %v1723_v53, %v1749_v62 }
 0x14b   : > { %vm523_vm7 = vcmp.gt.f32.partialorder %v1717_v50, 0.0  ;;  %v2029_v47 = vsel %vm650_vm12, %v586_v26, -1e+30  ;;  %v583_v1 = vsel %vm519_vm15, %v487_v30, %v551_v33  ;;  %v2033_v3 = vsel %vm653_vm6, %v589_v42, -1e+30 }
 0x14c   : > { %v584_v2 = vsel %vm520_vm13, %v488_v38, %v552_v46  ;;  %v726_v23 = vmax.f32 %v2019_v41, %v2029_v47  ;;  %v2039_v49 = vsel %vm647_vm5, %v583_v1, -1e+30  ;;  %v2047_v59 = vsel %vm654_vm11, %v590_v51, -1e+30 }
 0x14d   : > { %v2043_v53 = vsel %vm648_vm8, %v584_v2, -1e+30  ;;  %vm524_vm1 = vcmp.gt.f32.partialorder %v1726_v54, 0.0  ;;  %v587_v24 = vsel %vm523_vm7, %v1717_v50, %v1741_v60  ;;  %v732_v61 = vmax.f32 %v2033_v3, %v2047_v59 }
 0x14e   : > { %v723_v62 = vmax.f32 %v2039_v49, %v2043_v53  ;;  %727 = vmax.xlane.f32.xlu1 %v726_v23  ;;  %v588_v19 = vsel %vm524_vm1, %v1726_v54, %v1752_v63  ;;  %v2058_v29 = vsel %vm651_vm10, %v587_v24, -1e+30 }
 0x14f   : > { %v2061_v32 = vsel %vm652_vm9, %v588_v19, -1e+30 }
 0x150   : > { %724 = vmax.xlane.f32.xlu0 %v723_v62  ;;  %v729_v5 = vmax.f32 %v2058_v29, %v2061_v32 }
 0x152   : > { %733 = vmax.xlane.f32.xlu1 %v732_v61 }
 0x154   : > { %730 = vmax.xlane.f32.xlu0 %v729_v5 }
 0x1b5   : > { %v689_v50 = vpop.xlane.xlu0 %688 }
 0x1b6   : > { %v692_v60 = vpop.xlane.xlu1 %691  ;;  %v735_v54 = vsub.f32 %v1773_v13, %v689_v50  ;;  %v736_v63 = vsub.f32 %v1776_v14, %v689_v50 }
 0x1b7   : > { %v737_v0 = vsub.f32 %v1780_v16, %v692_v60  ;;  %v738_v4 = vsub.f32 %v1786_v18, %v692_v60 }
 0x1b8   : > { %v767_v6 = vmul.f32 1.442695, %v735_v54  ;;  %v769_v37 = vmul.f32 1.442695, %v736_v63 }
 0x1b9   : > { %v771_v15 = vmul.f32 1.442695, %v737_v0  ;;  %v773_v7 = vmul.f32 1.442695, %v738_v4 }
 0x1ba   : > { %1366 = vpow2.f32 %v767_v6  ;;  %v695_v57 = vpop.xlane.xlu0 %694 }
 0x1bb   : > { %1368 = vpow2.f32 %v771_v15  ;;  %v739_v30 = vsub.f32 %v1802_v39, %v695_v57  ;;  %v740_v34 = vsub.f32 %v1812_v44, %v695_v57 }
 0x1bc   : > { %v698_v28 = vpop.xlane.xlu1 %697  ;;  %1370 = vpow2.f32 %v773_v7 }
 0x1bd   : > { %v741_v13 = vsub.f32 %v1826_v56, %v698_v28  ;;  %v742_v14 = vsub.f32 %v1830_v45, %v698_v28  ;;  %1372 = vpow2.f32 %v769_v37  ;;  %v775_v16 = vmul.f32 1.442695, %v739_v30 }
 0x1be   : > { %v777_v38 = vmul.f32 1.442695, %v740_v34 }
 0x1bf   : > { %v779_v18 = vmul.f32 1.442695, %v741_v13  ;;  %v781_v36 = vmul.f32 1.442695, %v742_v14  ;;  %1374 = vpow2.f32 %v775_v16 }
 0x1c1   : > { %v704_v55 = vpop.xlane.xlu1 %703  ;;  %1376 = vpow2.f32 %v779_v18 }
 0x1c2   : > { %v745_v43 = vsub.f32 %v1853_v10, %v704_v55  ;;  %v746_v40 = vsub.f32 %v1857_v25, %v704_v55  ;;  %1378 = vpow2.f32 %v781_v36 }
 0x1c3   : > { %v701_v39 = vpop.xlane.xlu0 %700  ;;  %1380 = vpow2.f32 %v777_v38 }
 0x1c4   : > { %v787_v44 = vmul.f32 1.442695, %v745_v43  ;;  %v789_v33 = vmul.f32 1.442695, %v746_v40  ;;  %v743_v56 = vsub.f32 %v1866_v21, %v701_v39  ;;  %v744_v45 = vsub.f32 %v1876_v58, %v701_v39  ;;  %v2079_v46 = vpop.eup %1366 }
 0x1c5   : > { %v2081_v51 = vpop.eup %1368 }
 0x1c6   : > { %1382 = vpow2.f32 %v787_v44  ;;  %v783_v26 = vmul.f32 1.442695, %v743_v56  ;;  %v785_v10 = vmul.f32 1.442695, %v744_v45  ;;  %v2085_v2 = vpop.eup %1370 }
 0x1c7   : > { %v710_v42 = vpop.xlane.xlu1 %709  ;;  %1384 = vpow2.f32 %v789_v33  ;;  %v2087_v23 = vpop.eup %1372  ;;  %v834_v62 = vadd.f32 %v2085_v2, %v2081_v51 }
 0x1c8   : > { %v749_v25 = vsub.f32 %v1901_v27, %v710_v42  ;;  %v750_v1 = vsub.f32 %v1905_v22, %v710_v42  ;;  %1386 = vpow2.f32 %v783_v26  ;;  %v831_v19 = vadd.f32 %v2087_v23, %v2079_v46 }
 0x1c9   : > { %1388 = vpow2.f32 %v785_v10  ;;  %v2093_v61 = vpop.eup %1374  ;;  %835 = vadd.xlane.f32.xlu1 %v834_v62 }
 0x1ca   : > { %v795_v21 = vmul.f32 1.442695, %v749_v25  ;;  %v797_v58 = vmul.f32 1.442695, %v750_v1  ;;  %832 = vadd.xlane.f32.xlu0 %v831_v19 }
 0x1cb   : > { %v707_v24 = vpop.xlane.xlu0 %706  ;;  %v2097_v50 = vpop.eup %1376 }
 0x1cc   : > { %1390 = vpow2.f32 %v795_v21  ;;  %v747_v27 = vsub.f32 %v1914_v12, %v707_v24  ;;  %v748_v22 = vsub.f32 %v1931_v11, %v707_v24  ;;  %v2101_v63 = vpop.eup %1378 }
 0x1cd   : > { %v716_v5 = vpop.xlane.xlu1 %715  ;;  %1392 = vpow2.f32 %v797_v58  ;;  %v2103_v6 = vpop.eup %1380  ;;  %v840_v11 = vadd.f32 %v2101_v63, %v2097_v50 }
 0x1ce   : > { %v753_v60 = vsub.f32 %v1949_v52, %v716_v5  ;;  %v754_v54 = vsub.f32 %v1953_v35, %v716_v5  ;;  %v791_v0 = vmul.f32 1.442695, %v747_v27  ;;  %v793_v4 = vmul.f32 1.442695, %v748_v22 }
 0x1cf   : > { %v837_v37 = vadd.f32 %v2103_v6, %v2093_v61  ;;  %841 = vadd.xlane.f32.xlu1 %v840_v11 }
 0x1d0   : > { %v803_v15 = vmul.f32 1.442695, %v753_v60  ;;  %v805_v12 = vmul.f32 1.442695, %v754_v54  ;;  %1394 = vpow2.f32 %v791_v0  ;;  %v2109_v52 = vpop.eup %1382 }
 0x1d1   : > { %1396 = vpow2.f32 %v793_v4  ;;  %v2113_v30 = vpop.eup %1384  ;;  %838 = vadd.xlane.f32.xlu0 %v837_v37 }
 0x1d2   : > { %v713_v7 = vpop.xlane.xlu0 %712  ;;  %1398 = vpow2.f32 %v803_v15  ;;  %v2117_v14 = vpop.eup %1386 }
 0x1d3   : > { %v751_v35 = vsub.f32 %v1979_v20, %v713_v7  ;;  %v752_v57 = vsub.f32 %v1983_v48, %v713_v7  ;;  %v722_v28 = vpop.xlane.xlu1 %721  ;;  %1400 = vpow2.f32 %v805_v12  ;;  %v846_v20 = vadd.f32 %v2113_v30, %v2109_v52  ;;  %v2121_v36 = vpop.eup %1388 }
 0x1d4   : > { %v757_v34 = vsub.f32 %v1991_v17, %v722_v28  ;;  %v758_v13 = vsub.f32 %v1995_v9, %v722_v28  ;;  %v843_v17 = vadd.f32 %v2121_v36, %v2117_v14 }
 0x1d5   : > { %v799_v16 = vmul.f32 1.442695, %v751_v35  ;;  %v801_v18 = vmul.f32 1.442695, %v752_v57  ;;  %847 = vadd.xlane.f32.xlu1 %v846_v20 }
 0x1d6   : > { %v811_v48 = vmul.f32 1.442695, %v757_v34  ;;  %v813_v38 = vmul.f32 1.442695, %v758_v13  ;;  %v2125_v9 = vpop.eup %1390  ;;  %844 = vadd.xlane.f32.xlu0 %v843_v17 }
 0x1d7   : > { %1402 = vpow2.f32 %v799_v16  ;;  %v719_v55 = vpop.xlane.xlu0 %718  ;;  %v2129_v39 = vpop.eup %1392 }
 0x1d8   : > { %1404 = vpow2.f32 %v801_v18  ;;  %v755_v43 = vsub.f32 %v2009_v8, %v719_v55  ;;  %v756_v40 = vsub.f32 %v2013_v31, %v719_v55  ;;  %v852_v56 = vadd.f32 %v2129_v39, %v2125_v9 }
 0x1d9   : > { %1406 = vpow2.f32 %v811_v48 }
 0x1da   : > { %1408 = vpow2.f32 %v813_v38  ;;  %v807_v44 = vmul.f32 1.442695, %v755_v43  ;;  %v809_v33 = vmul.f32 1.442695, %v756_v40  ;;  %v2133_v26 = vpop.eup %1394  ;;  %853 = vadd.xlane.f32.xlu1 %v852_v56 }
 0x1db   : > { %v728_v45 = vpop.xlane.xlu1 %727  ;;  %v2137_v31 = vpop.eup %1396 }
 0x1dc   : > { %1410 = vpow2.f32 %v807_v44  ;;  %v761_v42 = vsub.f32 %v2019_v41, %v728_v45  ;;  %v762_v8 = vsub.f32 %v2029_v47, %v728_v45  ;;  %v2141_v21 = vpop.eup %1398  ;;  %v849_v24 = vadd.f32 %v2137_v31, %v2133_v26 }
 0x1dd   : > { %v725_v10 = vpop.xlane.xlu0 %724  ;;  %1412 = vpow2.f32 %v809_v33  ;;  %v2145_v19 = vpop.eup %1400 }
 0x1de   : > { %v759_v25 = vsub.f32 %v2039_v49, %v725_v10  ;;  %v760_v1 = vsub.f32 %v2043_v53, %v725_v10  ;;  %v819_v58 = vmul.f32 1.442695, %v761_v42  ;;  %v821_v62 = vmul.f32 1.442695, %v762_v8  ;;  %850 = vadd.xlane.f32.xlu0 %v849_v24 }
 0x1df   : > { %v734_v27 = vpop.xlane.xlu1 %733  ;;  %v858_v53 = vadd.f32 %v2145_v19, %v2141_v21 }
 0x1e0   : > { %v815_v41 = vmul.f32 1.442695, %v759_v25  ;;  %v817_v47 = vmul.f32 1.442695, %v760_v1  ;;  %1414 = vpow2.f32 %v819_v58  ;;  %v765_v22 = vsub.f32 %v2033_v3, %v734_v27 }
 0x1e1   : > { %v766_v5 = vsub.f32 %v2047_v59, %v734_v27  ;;  %v731_v49 = vpop.xlane.xlu0 %730  ;;  %v2151_v60 = vpop.eup %1402  ;;  %1416 = vpow2.f32 %v821_v62  ;;  %859 = vadd.xlane.f32.xlu1 %v858_v53 }
 0x1e2   : > { %v763_v54 = vsub.f32 %v2058_v29, %v731_v49  ;;  %v764_v0 = vsub.f32 %v2061_v32, %v731_v49  ;;  %v2155_v4 = vpop.eup %1404  ;;  %1418 = vpow2.f32 %v815_v41  ;;  %v827_v15 = vmul.f32 1.442695, %v765_v22 }
 0x1e3   : > { %v829_v12 = vmul.f32 1.442695, %v766_v5  ;;  %v2157_v3 = vpop.eup %1406  ;;  %1420 = vpow2.f32 %v817_v47  ;;  %v855_v7 = vadd.f32 %v2155_v4, %v2151_v60 }
 0x1e4   : > { %v823_v59 = vmul.f32 1.442695, %v763_v54  ;;  %v825_v11 = vmul.f32 1.442695, %v764_v0  ;;  %v2161_v37 = vpop.eup %1408  ;;  %1422 = vpow2.f32 %v827_v15 }
 0x1e5   : > { %1424 = vpow2.f32 %v829_v12  ;;  %856 = vadd.xlane.f32.xlu0 %v855_v7  ;;  %v864_v29 = vadd.f32 %v2161_v37, %v2157_v3 }
 0x1e6   : > { %v2165_v32 = vpop.eup %1410  ;;  %1426 = vpow2.f32 %v823_v59 }
 0x1e7   : > { %v2167_v35 = vpop.eup %1412  ;;  %1428 = vpow2.f32 %v825_v11  ;;  %865 = vadd.xlane.f32.xlu1 %v864_v29 }
 0x1e8   : > { %v861_v57 = vadd.f32 %v2167_v35, %v2165_v32 }
 0x1ea   : > { %v2171_v28 = vpop.eup %1414  ;;  %862 = vadd.xlane.f32.xlu0 %v861_v57 }
 0x1eb   : > { %v2173_v34 = vpop.eup %1416 }
 0x1ec   : > { %v2175_v13 = vpop.eup %1418  ;;  %v870_v16 = vadd.f32 %v2173_v34, %v2171_v28 }
 0x1ed   : > { %v2179_v18 = vpop.eup %1420 }
 0x1ee   : > { %v2181_v20 = vpop.eup %1422  ;;  %871 = vadd.xlane.f32.xlu1 %v870_v16  ;;  %v867_v48 = vadd.f32 %v2179_v18, %v2175_v13 }
 0x1ef   : > { %v2185_v38 = vpop.eup %1424 }
 0x1f0   : > { %v2187_v55 = vpop.eup %1426  ;;  %868 = vadd.xlane.f32.xlu0 %v867_v48  ;;  %v876_v17 = vadd.f32 %v2185_v38, %v2181_v20 }
 0x1f1   : > { %v2191_v43 = vpop.eup %1428 }
 0x1f2   : > { %877 = vadd.xlane.f32.xlu1 %v876_v17  ;;  %v873_v40 = vadd.f32 %v2191_v43, %v2187_v55 }
 0x1f4   : > { %874 = vadd.xlane.f32.xlu0 %v873_v40 }
 0x256   : > { %v836_v44 = vpop.xlane.xlu1 %835 }
 0x257   : > { %1430 = vrcp.f32 %v836_v44  ;;  %v833_v33 = vpop.xlane.xlu0 %832 }
 0x258   : > { %1432 = vrcp.f32 %v833_v33 }
 0x25c   : > { %v842_v45 = vpop.xlane.xlu1 %841 }
 0x25e   : > { %v839_v56 = vpop.xlane.xlu0 %838 }
 0x25f   : > { %1434 = vrcp.f32 %v839_v56 }
 0x260   : > { %1436 = vrcp.f32 %v842_v45 }
 0x261   : > { %v1431_v42 = vpop.eup %1430 }
 0x262   : > { %v1433_v10 = vpop.eup %1432  ;;  %v848_v58 = vpop.xlane.xlu1 %847  ;;  %v898_v62 = vmul.f32 %v1431_v42, %v2085_v2  ;;  %v897_v41 = vmul.f32 %v1431_v42, %v2081_v51 }
 0x263   : > { %v845_v8 = vpop.xlane.xlu0 %844  ;;  %v896_v25 = vmul.f32 %v1433_v10, %v2087_v23  ;;  %v895_v1 = vmul.f32 %v1433_v10, %v2079_v46  ;;  %v2230_v10 = vld [vmem:[%s2279_s5] ss:$0 sm:$0xff] }
 0x264   : > { %1438 = vrcp.f32 %v845_v8 }
 0x265   : > { %998 = vmatprep.mubr.f32.mxu1 %v896_v25  ;;  %1440 = vrcp.f32 %v848_v58 }
 0x266   : > { %999 = vmatmul.mubr.f32.vlgmr.msra.gmra.mrb[0].mxu1 %v895_v1 }
 0x267   : > { %1003 = vmatprep.mubr.f32.mxu1 %v898_v62  ;;  %v854_v23 = vpop.xlane.xlu1 %853 }
 0x269   : > { %v1435_v24 = vpop.eup %1434 }
 0x26a   : > { %v900_v27 = vmul.f32 %v1435_v24, %v2103_v6  ;;  %v1437_v22 = vpop.eup %1436  ;;  %1004 = vmatmul.mubr.f32.gmra.mrb[2].mxu1 %v897_v41  ;;  %v899_v46 = vmul.f32 %v1435_v24, %v2093_v61 }
 0x26b   : > { %v851_v47 = vpop.xlane.xlu0 %850  ;;  %v902_v5 = vmul.f32 %v1437_v22, %v2101_v63  ;;  %v901_v2 = vmul.f32 %v1437_v22, %v2097_v50 }
 0x26c   : > { %1008 = vmatprep.mubr.f32.mxu1 %v900_v27  ;;  %1442 = vrcp.f32 %v851_v47 }
 0x26d   : > { %1444 = vrcp.f32 %v854_v23 }
 0x26e   : > { %v1439_v49 = vpop.eup %1438  ;;  %1009 = vmatmul.mubr.f32.gmra.mrb[4].mxu1 %v899_v46  ;;  %v860_v0 = vpop.xlane.xlu1 %859 }
 0x26f   : > { %1013 = vmatprep.mubr.f32.mxu1 %v902_v5  ;;  %v904_v51 = vmul.f32 %v1439_v49, %v2121_v36  ;;  %v1441_v54 = vpop.eup %1440  ;;  %v903_v6 = vmul.f32 %v1439_v49, %v2117_v14 }
 0x270   : > { %v906_v61 = vmul.f32 %v1441_v54, %v2113_v30  ;;  %v905_v63 = vmul.f32 %v1441_v54, %v2109_v52 }
 0x272   : > { %v857_v53 = vpop.xlane.xlu0 %856  ;;  %1014 = vmatmul.mubr.f32.gmra.mrb[6].mxu1 %v901_v2 }
 0x273   : > { %1018 = vmatprep.mubr.f32.mxu1 %v904_v51  ;;  %1446 = vrcp.f32 %v857_v53 }
 0x274   : > { %1448 = vrcp.f32 %v860_v0  ;;  %v866_v11 = vpop.xlane.xlu1 %865 }
 0x276   : > { %v1443_v15 = vpop.eup %1442  ;;  %1019 = vmatmul.mubr.f32.gmra.mrb[8].mxu1 %v903_v6 }
 0x277   : > { %1023 = vmatprep.mubr.f32.mxu1 %v906_v61  ;;  %v863_v12 = vpop.xlane.xlu0 %862  ;;  %v908_v50 = vmul.f32 %v1443_v15, %v2137_v31  ;;  %v1445_v59 = vpop.eup %1444  ;;  %v907_v36 = vmul.f32 %v1443_v15, %v2133_v26 }
 0x278   : > { %1450 = vrcp.f32 %v863_v12  ;;  %v910_v14 = vmul.f32 %v1445_v59, %v2129_v39  ;;  %v909_v30 = vmul.f32 %v1445_v59, %v2125_v9 }
 0x279   : > { %1452 = vrcp.f32 %v866_v11 }
 0x27a   : > { %1024 = vmatmul.mubr.f32.gmra.mrb[10].mxu1 %v905_v63 }
 0x27b   : > { %1028 = vmatprep.mubr.f32.mxu1 %v908_v50  ;;  %v872_v16 = vpop.xlane.xlu1 %871 }
 0x27d   : > { %v1447_v7 = vpop.eup %1446  ;;  %v869_v29 = vpop.xlane.xlu0 %868 }
 0x27e   : > { %1029 = vmatmul.mubr.f32.gmra.mrb[12].mxu1 %v907_v36  ;;  %v912_v52 = vmul.f32 %v1447_v7, %v2155_v4  ;;  %v1449_v57 = vpop.eup %1448  ;;  %1454 = vrcp.f32 %v869_v29  ;;  %v911_v31 = vmul.f32 %v1447_v7, %v2151_v60 }
 0x27f   : > { %1033 = vmatprep.mubr.f32.mxu1 %v910_v14  ;;  %v914_v26 = vmul.f32 %v1449_v57, %v2145_v19  ;;  %1456 = vrcp.f32 %v872_v16  ;;  %v913_v39 = vmul.f32 %v1449_v57, %v2141_v21  ;;  %v878_v44 = vpop.xlane.xlu1 %877 }
 0x281   : > { %v875_v17 = vpop.xlane.xlu0 %874 }
 0x282   : > { %1034 = vmatmul.mubr.f32.gmra.mrb[14].mxu1 %v909_v30  ;;  %v1451_v48 = vpop.eup %1450  ;;  %1458 = vrcp.f32 %v875_v17 }
 0x283   : > { %1038 = vmatprep.mubr.f32.mxu1 %v912_v52  ;;  %v916_v9 = vmul.f32 %v1451_v48, %v2167_v35  ;;  %v1453_v40 = vpop.eup %1452  ;;  %v915_v4 = vmul.f32 %v1451_v48, %v2165_v32  ;;  %1460 = vrcp.f32 %v878_v44 }
 0x284   : > { %v918_v60 = vmul.f32 %v1453_v40, %v2161_v37  ;;  %v917_v19 = vmul.f32 %v1453_v40, %v2157_v3 }
 0x286   : > { %1039 = vmatmul.mubr.f32.gmra.mrb[16].mxu1 %v911_v31 }
 0x287   : > { %1043 = vmatprep.mubr.f32.mxu1 %v914_v26 }
 0x288   : > { %v1455_v33 = vpop.eup %1454 }
 0x289   : > { %v920_v21 = vmul.f32 %v1455_v33, %v2179_v18  ;;  %v1457_v56 = vpop.eup %1456  ;;  %v919_v35 = vmul.f32 %v1455_v33, %v2175_v13 }
 0x28a   : > { %1044 = vmatmul.mubr.f32.gmra.mrb[18].mxu1 %v913_v39  ;;  %v922_v45 = vmul.f32 %v1457_v56, %v2173_v34  ;;  %v921_v37 = vmul.f32 %v1457_v56, %v2171_v28 }
 0x28b   : > { %1048 = vmatprep.mubr.f32.mxu1 %v916_v9 }
 0x28c   : > { %v1459_v42 = vpop.eup %1458 }
 0x28d   : > { %v924_v32 = vmul.f32 %v1459_v42, %v2191_v43  ;;  %v1461_v8 = vpop.eup %1460  ;;  %v923_v3 = vmul.f32 %v1459_v42, %v2187_v55 }
 0x28e   : > { %1049 = vmatmul.mubr.f32.gmra.mrb[20].mxu1 %v915_v4  ;;  %v926_v18 = vmul.f32 %v1461_v8, %v2185_v38  ;;  %v925_v13 = vmul.f32 %v1461_v8, %v2181_v20 }
 0x28f   : > { %1053 = vmatprep.mubr.f32.mxu1 %v918_v60 }
 0x292   : > { %1054 = vmatmul.mubr.f32.gmra.mrb[22].mxu1 %v917_v19 }
 0x293   : > { %1058 = vmatprep.mubr.f32.mxu1 %v920_v21 }
 0x296   : > { %1059 = vmatmul.mubr.f32.gmra.mrb[24].mxu1 %v919_v35 }
 0x297   : > { %1063 = vmatprep.mubr.f32.mxu1 %v922_v45 }
 0x29a   : > { %1064 = vmatmul.mubr.f32.gmra.mrb[26].mxu1 %v921_v37 }
 0x29b   : > { %1068 = vmatprep.mubr.f32.mxu1 %v924_v32 }
 0x29e   : > { %1069 = vmatmul.mubr.f32.gmra.mrb[28].mxu1 %v923_v3 }
 0x29f   : > { %1073 = vmatprep.mubr.f32.mxu1 %v926_v18 }
 0x2a2   : > { %1074 = vmatmul.mubr.f32.gmra.mrb[30].mxu1 %v925_v13 }
 0x339   : > { %v1246_v34 = vpop.f32.mrb[0].mxu1 }
 0x33a   : > { %v1247_v28 = vpop.f32.mrb[1].mxu1 }
 0x33b   : > { %v1248_v43 = vadd.f32 %v1247_v28, %v1246_v34 }
 0x33d   : > { %v1001_v20 = vadd.f32 %v1248_v43, %v2230_v10  ;;  %v1249_v38 = vpop.f32.mrb[2].mxu1 }
 0x33e   : > { %v1250_v55 = vpop.f32.mrb[3].mxu1 }
 0x33f   : > { %1079 = vst [vmem:[%s2237_s17] sm:$0xff] %v1001_v20  ;;  %v1251_v25 = vadd.f32 %v1250_v55, %v1249_v38 }
 0x341   : > { %v1006_v1 = vadd.f32 %v1251_v25, %v2230_v10  ;;  %v1252_v58 = vpop.f32.mrb[4].mxu1 }
 0x342   : > { %v1253_v62 = vpop.f32.mrb[5].mxu1 }
 0x343   : > { %1080 = vst [vmem:[%s2237_s17 + $0x8] sm:$0xff] %v1006_v1  ;;  %v1254_v24 = vadd.f32 %v1253_v62, %v1252_v58 }
 0x345   : > { %v1011_v41 = vadd.f32 %v1254_v24, %v2230_v10  ;;  %v1255_v47 = vpop.f32.mrb[6].mxu1 }
 0x346   : > { %v1256_v27 = vpop.f32.mrb[7].mxu1 }
 0x347   : > { %1081 = vst [vmem:[%s2237_s17 + $0x10] sm:$0xff] %v1011_v41  ;;  %v1257_v22 = vadd.f32 %v1256_v27, %v1255_v47 }
 0x349   : > { %v1016_v46 = vadd.f32 %v1257_v22, %v2230_v10  ;;  %v1258_v23 = vpop.f32.mrb[8].mxu1 }
 0x34a   : > { %v1259_v5 = vpop.f32.mrb[9].mxu1 }
 0x34b   : > { %1082 = vst [vmem:[%s2237_s17 + $0x18] sm:$0xff] %v1016_v46  ;;  %v1260_v49 = vadd.f32 %v1259_v5, %v1258_v23 }
 0x34d   : > { %v1021_v2 = vadd.f32 %v1260_v49, %v2230_v10  ;;  %v1261_v53 = vpop.f32.mrb[10].mxu1 }
 0x34e   : > { %v1262_v51 = vpop.f32.mrb[11].mxu1 }
 0x34f   : > { %1083 = vst [vmem:[%s2237_s17 + $0x20] sm:$0xff] %v1021_v2  ;;  %v1263_v54 = vadd.f32 %v1262_v51, %v1261_v53 }
 0x351   : > { %v1026_v6 = vadd.f32 %v1263_v54, %v2230_v10  ;;  %v1264_v0 = vpop.f32.mrb[12].mxu1 }
 0x352   : > { %v1265_v61 = vpop.f32.mrb[13].mxu1 }
 0x353   : > { %1084 = vst [vmem:[%s2237_s17 + $0x28] sm:$0xff] %v1026_v6  ;;  %v1266_v15 = vadd.f32 %v1265_v61, %v1264_v0 }
 0x355   : > { %v1031_v63 = vadd.f32 %v1266_v15, %v2230_v10  ;;  %v1267_v12 = vpop.f32.mrb[14].mxu1 }
 0x356   : > { %v1268_v50 = vpop.f32.mrb[15].mxu1 }
 0x357   : > { %1085 = vst [vmem:[%s2237_s17 + $0x30] sm:$0xff] %v1031_v63  ;;  %v1269_v59 = vadd.f32 %v1268_v50, %v1267_v12 }
 0x359   : > { %v1036_v36 = vadd.f32 %v1269_v59, %v2230_v10  ;;  %v1270_v11 = vpop.f32.mrb[16].mxu1 }
 0x35a   : > { %v1271_v14 = vpop.f32.mrb[17].mxu1 }
 0x35b   : > { %1086 = vst [vmem:[%s2237_s17 + $0x38] sm:$0xff] %v1036_v36  ;;  %v1272_v7 = vadd.f32 %v1271_v14, %v1270_v11 }
 0x35d   : > { %v1041_v30 = vadd.f32 %v1272_v7, %v2230_v10  ;;  %v1273_v29 = vpop.f32.mrb[18].mxu1 }
 0x35e   : > { %v1274_v52 = vpop.f32.mrb[19].mxu1 }
 0x35f   : > { %1087 = vst [vmem:[%s2237_s17 + $0x40] sm:$0xff] %v1041_v30  ;;  %v1275_v57 = vadd.f32 %v1274_v52, %v1273_v29 }
 0x361   : > { %v1046_v31 = vadd.f32 %v1275_v57, %v2230_v10  ;;  %v1276_v16 = vpop.f32.mrb[20].mxu1 }
 0x362   : > { %v1277_v26 = vpop.f32.mrb[21].mxu1 }
 0x363   : > { %1088 = vst [vmem:[%s2237_s17 + $0x48] sm:$0xff] %v1046_v31  ;;  %v1278_v48 = vadd.f32 %v1277_v26, %v1276_v16 }
 0x365   : > { %v1051_v39 = vadd.f32 %v1278_v48, %v2230_v10  ;;  %v1279_v17 = vpop.f32.mrb[22].mxu1 }
 0x366   : > { %v1280_v9 = vpop.f32.mrb[23].mxu1 }
 0x367   : > { %1089 = vst [vmem:[%s2237_s17 + $0x50] sm:$0xff] %v1051_v39  ;;  %v1281_v40 = vadd.f32 %v1280_v9, %v1279_v17 }
 0x369   : > { %v1056_v4 = vadd.f32 %v1281_v40, %v2230_v10  ;;  %v1282_v44 = vpop.f32.mrb[24].mxu1 }
 0x36a   : > { %v1283_v60 = vpop.f32.mrb[25].mxu1 }
 0x36b   : > { %1090 = vst [vmem:[%s2237_s17 + $0x58] sm:$0xff] %v1056_v4  ;;  %v1284_v33 = vadd.f32 %v1283_v60, %v1282_v44 }
 0x36d   : > { %v1061_v19 = vadd.f32 %v1284_v33, %v2230_v10  ;;  %v1285_v21 = vpop.f32.mrb[26].mxu1 }
 0x36e   : > { %v1286_v56 = vpop.f32.mrb[27].mxu1 }
 0x36f   : > { %1091 = vst [vmem:[%s2237_s17 + $0x60] sm:$0xff] %v1061_v19  ;;  %v1287_v35 = vadd.f32 %v1286_v56, %v1285_v21 }
 0x371   : > { %v1066_v45 = vadd.f32 %v1287_v35, %v2230_v10  ;;  %v1288_v42 = vpop.f32.mrb[28].mxu1 }
 0x372   : > { %v1289_v37 = vpop.f32.mrb[29].mxu1 }
 0x373   : > { %1092 = vst [vmem:[%s2237_s17 + $0x68] sm:$0xff] %v1066_v45  ;;  %v1290_v32 = vadd.f32 %v1289_v37, %v1288_v42 }
 0x375   : > { %v1071_v8 = vadd.f32 %v1290_v32, %v2230_v10  ;;  %v1291_v3 = vpop.f32.mrb[30].mxu1 }
 0x376   : > { %v1292_v18 = vpop.f32.mrb[31].mxu1 }
 0x377   : > { %1093 = vst [vmem:[%s2237_s17 + $0x70] sm:$0xff] %v1071_v8  ;;  %v1293_v13 = vadd.f32 %v1292_v18, %v1291_v3 }
 0x379   : > { %v1076_v34 = vadd.f32 %v1293_v13, %v2230_v10 }
 0x37b   : > { %1094 = vst [vmem:[%s2237_s17 + $0x78] sm:$0xff] %v1076_v34 }
 0x37c PF: > { %s16_s21 = sadd.s32 1, %s1468_s21  }
 0x37d   : > { %p13_p4 = scmp.ge.s32.totalorder %s16_s21, 4  }
 0x37f   :  { %15 = sbr.rel (!%p13_p4) target bundleno = 1 (0x1), region = 77 }

</bundles_post_ra>
